<compile_context>
chip_gen: v5e
topology: v5e:2x2
jax: 0.10.0
libtpu: 0.0.40
codegen_flags: <defaults>
</compile_context>

<pallas_src>
import functools

import numpy as np

import jax
import jax.numpy as jnp
from jax.experimental import pallas as pl
from jax.experimental.pallas import tpu as pltpu


def _round_up(a, b):
    return ((a + b - 1) // b) * b


def _phase_conv_kernel(xm_ref, xh_ref, w_ref, shift_ref, o_ref, *, tap_offsets):
    # xm_ref:    (1, th, W+2, Cin)      bf16 - th original-resolution rows (zero-padded in W)
    # xh_ref:    (1, 2,  W+2, Cin)      bf16 - merged 2-row halo below the tile
    # w_ref:     (S*S*T*T, Cin, Cpad)   bf16 - polyphase conv weights, BN scale folded in
    # shift_ref: (1, Cpad)              f32  - folded BN shift (beta - mean*scale)
    # o_ref:     (1, S*S, th, W, Cout)  bf16 - per-phase outputs (interleaved in the wrapper)
    th = xm_ref.shape[1]
    cin = xm_ref.shape[3]
    w_out = o_ref.shape[3]
    cout = o_ref.shape[4]
    s = len(tap_offsets)
    t_taps = max(len(t) for t in tap_offsets)

    # (th + 2)-row padded-input window for this tile (tile rows + bottom halo).
    xt = jnp.concatenate([xm_ref[0], xh_ref[0]], axis=0)            # (th+2, W+2, cin)
    # The (at most) 3 column shifts are taken once and reused by every phase, so there are
    # at most 3 sublane-shift copies per grid step instead of one per tap.
    cols = [xt[:, c:c + w_out, :] for c in range(3)]                # each (th+2, W, cin)

    shift = shift_ref[...]                                          # (1, Cpad)
    for py in range(s):
        rofs = tap_offsets[py]
        for px in range(s):
            cofs = tap_offsets[px]
            acc = None
            for jr, ro in enumerate(rofs):
                for jc, co in enumerate(cofs):
                    # Row slices are major-dim slices (cheap); matmul is bf16 in, f32 acc.
                    patch = cols[co][ro:ro + th].reshape(th * w_out, cin)
                    k_lin = ((py * s + px) * t_taps + jr) * t_taps + jc
                    part = jnp.dot(patch, w_ref[k_lin],
                                   preferred_element_type=jnp.float32)
                    acc = part if acc is None else acc + part
            # Folded BN shift + ReLU in f32, slice off padded channels, store bf16.
            y = jnp.maximum(acc + shift, 0.0)                       # (th*W, Cpad) f32
            o_ref[0, py * s + px] = (
                y[:, :cout].astype(o_ref.dtype).reshape(th, w_out, cout))


@functools.partial(jax.jit, static_argnames=("stride", "eps"))
def upsample_conv2d_block(x_nchw, weight_oihw, gamma, beta, running_mean,
                          running_var, *, stride, eps=1e-5):
    """Forward of UpsampleConv2dBlock (eval-mode BN).  Input/output are NCHW (PyTorch)."""
    N, Cin, H, W = x_nchw.shape
    Cout = weight_oihw.shape[0]
    Hs, Ws = H * stride, W * stride
    Cpad = _round_up(Cout, 128)

    # ---- polyphase decomposition of nearest-upsample + 3x3 conv -------------------------
    # Output row Y = stride*iy + p reads upsampled rows Y-1, Y, Y+1 which collapse onto the
    # original-resolution rows iy + off, off in {-1, 0, +1}.  A[p, j, dy] sums the 3 vertical
    # taps per original-row offset; tap_offsets[p] lists the offsets actually used (<= 2 for
    # stride >= 2), expressed as offsets into the zero-padded input (pad row 0 == row -1).
    t_taps = 3 if stride == 1 else 2
    A = np.zeros((stride, t_taps, 3), np.float32)
    tap_offsets = []
    for p in range(stride):
        offs = sorted({(p + dy - 1) // stride for dy in range(3)})
        tap_offsets.append(tuple(o + 1 for o in offs))
        for j, o in enumerate(offs):
            for dy in range(3):
                if (p + dy - 1) // stride == o:
                    A[p, j, dy] = 1.0
    tap_offsets = tuple(tap_offsets)

    # ---- fold BatchNorm (running-stats / eval semantics) into the conv weights ----------
    # TODO(synk): training-mode BatchNorm (batch statistics) is not implemented.
    scale = (gamma / jnp.sqrt(running_var + eps)).astype(jnp.float32)       # (Cout,)
    shift = (beta - running_mean * scale).astype(jnp.float32)               # (Cout,)
    w_hwio = jnp.transpose(weight_oihw, (2, 3, 1, 0)).astype(jnp.float32)   # (3,3,Cin,Cout)
    w_hwio = w_hwio * scale[None, None, None, :]                            # fold BN scale
    # (phase_y, phase_x, row_tap, col_tap, Cin, Cout) polyphase weights.
    w_phase = jnp.einsum("prk,qcl,klio->pqrcio", A, A, w_hwio)
    w_pad = jnp.zeros((stride, stride, t_taps, t_taps, Cin, Cpad), jnp.bfloat16)
    w_pad = w_pad.at[..., :Cout].set(w_phase.astype(jnp.bfloat16))
    w_pad = w_pad.reshape(stride * stride * t_taps * t_taps, Cin, Cpad)
    shift_pad = jnp.zeros((1, Cpad), jnp.float32).at[0, :Cout].set(shift)

    # ---- choose an input-row tile (original-resolution rows per grid step) --------------
    # th_in is even (so the 2-row halo block is block-aligned); H need not divide it (rows
    # are padded below).  Footprint accounts for lane padding, double buffering, the concat
    # window, column-shift copies and the f32 accumulators -> safe on v7x's 64 MiB VMEM.
    cin_v = _round_up(Cin, 128)          # VMEM lane padding for narrow channel counts
    cout_v = Cpad
    budget = 12 << 20
    vmem_limit = 48 << 20

    def footprint(th):
        in_blk = th * (W + 2) * cin_v * 2
        halo_blk = 2 * (W + 2) * cin_v * 2
        w_blk = w_pad.shape[0] * _round_up(Cin, 16) * Cpad * 2
        shift_blk = Cpad * 4
        out_blk = stride * stride * th * W * cout_v * 2
        dbuf = 2 * (in_blk + halo_blk + w_blk + shift_blk + out_blk)   # double buffering
        xt_tmp = (th + 2) * (W + 2) * cin_v * 2                        # concat window
        col_tmp = 3 * (th + 2) * W * cin_v * 2                         # column-shift copies
        acc_tmp = 2 * th * W * Cpad * 4                                # acc + part (f32)
        return dbuf + xt_tmp + col_tmp + acc_tmp

    # Keep >= 2 row tiles per image when possible (pipelining + megacore work at N == 1).
    max_tile = max(2, _round_up((H + 1) // 2, 2))
    th_in = 2
    for cand in range(2, max_tile + 1, 2):
        if footprint(cand) <= budget:
            th_in = cand
    if footprint(th_in) > vmem_limit:
        # TODO(synk): fall back to W tiling for extremely wide rows instead of failing.
        raise ValueError("UpsampleConv2dBlock kernel: a single row tile does not fit in VMEM")

    num_tiles = (H + th_in - 1) // th_in
    h_pad = num_tiles * th_in

    # ---- input prep: NCHW -> NHWC (bf16), zero pad: 1 conv-halo col each side, 1 conv-halo
    # row on top, (1 + row padding up to a tile multiple) rows at the bottom ---------------
    # TODO(synk): accepting NHWC in/out would remove both wrapper-side layout transposes.
    x = jnp.transpose(x_nchw, (0, 2, 3, 1)).astype(jnp.bfloat16)            # (N, H, W, Cin)
    xp = jnp.pad(x, ((0, 0), (1, 1 + h_pad - H), (1, 1), (0, 0)))           # (N, h_pad+2, W+2, Cin)

    taps_per_step = sum(len(t) for t in tap_offsets) ** 2
    cost = pl.CostEstimate(
        flops=2 * N * num_tiles * th_in * W * Cin * Cpad * taps_per_step,
        transcendentals=0,
        bytes_accessed=(xp.size * 2 + w_pad.size * 2 + shift_pad.size * 4
                        + N * stride * stride * h_pad * W * Cout * 2))

    out5 = pl.pallas_call(
        functools.partial(_phase_conv_kernel, tap_offsets=tap_offsets),
        out_shape=jax.ShapeDtypeStruct(
            (N, stride * stride, h_pad, W, Cout), jnp.bfloat16),
        grid_spec=pltpu.PrefetchScalarGridSpec(
            num_scalar_prefetch=0,
            grid=(N, num_tiles),
            in_specs=[
                # main window: padded rows [t*th_in, (t+1)*th_in)
                pl.BlockSpec((1, th_in, W + 2, Cin), lambda n, t: (n, t, 0, 0)),
                # merged 2-row halo below the tile (th_in is even -> block-aligned)
                pl.BlockSpec((1, 2, W + 2, Cin),
                             lambda n, t: (n, (t + 1) * (th_in // 2), 0, 0)),
                # polyphase weights + folded BN shift: constant blocks, stay resident
                pl.BlockSpec(w_pad.shape, lambda n, t: (0, 0, 0)),
                pl.BlockSpec((1, Cpad), lambda n, t: (0, 0)),
            ],
            out_specs=pl.BlockSpec((1, stride * stride, th_in, W, Cout),
                                   lambda n, t: (n, 0, t, 0, 0)),
        ),
        compiler_params=pltpu.CompilerParams(
            dimension_semantics=("parallel", "parallel"),
            vmem_limit_bytes=vmem_limit,
        ),
        cost_estimate=cost,
    )(xp, xp, w_pad, shift_pad)

    # Interleave the phases and go back to NCHW in a single transpose:
    #   out[n, c, stride*iy + py, stride*ix + px] = out5[n, py*stride + px, iy, ix, c]
    out6 = out5.reshape(N, stride, stride, h_pad, W, Cout)
    out = jnp.transpose(out6, (0, 5, 3, 1, 4, 2)).reshape(N, Cout, stride * h_pad, Ws)
    return out[:, :, :Hs, :].astype(jnp.float32)


def _reference(x_nchw, weight_oihw, gamma, beta, mean, var, stride, eps=1e-5):
    """Pure-JAX f32 reference of the same forward pass (for verification)."""
    xu = jnp.repeat(jnp.repeat(x_nchw, stride, axis=2), stride, axis=3)
    y = jax.lax.conv_general_dilated(
        xu, weight_oihw, window_strides=(1, 1), padding=((1, 1), (1, 1)),
        dimension_numbers=("NCHW", "OIHW", "NCHW"),
        precision=jax.lax.Precision.HIGHEST)
    s = (gamma / jnp.sqrt(var + eps)).reshape(1, -1, 1, 1)
    b = beta.reshape(1, -1, 1, 1) - mean.reshape(1, -1, 1, 1) * s
    return jnp.maximum(y * s + b, 0.0)


if __name__ == "__main__":
    key = jax.random.PRNGKey(0)
    k_x, k_w, k_g, k_b, k_m, k_v = jax.random.split(key, 6)

    # Small shapes consistent with the module (2 row tiles -> exercises the halo path).
    batch, in_channels, out_channels, H, W, stride = 2, 4, 8, 16, 16, 2

    x = jax.random.normal(k_x, (batch, in_channels, H, W), jnp.float32)
    weight = jax.random.normal(k_w, (out_channels, in_channels, 3, 3), jnp.float32) * 0.1
    gamma = 1.0 + 0.1 * jax.random.normal(k_g, (out_channels,), jnp.float32)
    beta = 0.1 * jax.random.normal(k_b, (out_channels,), jnp.float32)
    running_mean = 0.1 * jax.random.normal(k_m, (out_channels,), jnp.float32)
    running_var = 0.5 + jax.random.uniform(k_v, (out_channels,), jnp.float32)

    out = upsample_conv2d_block(x, weight, gamma, beta, running_mean,
                                running_var, stride=stride)
    out = jax.block_until_ready(out)

    ref = _reference(x, weight, gamma, beta, running_mean, running_var, stride)
    assert out.shape == (batch, out_channels, H * stride, W * stride), out.shape
    max_err = float(jnp.max(jnp.abs(out - ref)))
    # bf16 activations/weights into the MXU (f32 acc) and a bf16 store -> small rounding.
    assert jnp.allclose(out, ref, atol=2e-2, rtol=2e-2), \
        f"mismatch vs reference (max abs err {max_err})"

    print("KERNEL_OK")
</pallas_src>

<mosaic_0001>
module attributes {stable_mosaic.version = 11 : i64} {
  func.func @_phase_conv_kernel(%arg0: i32, %arg1: i32, %arg2: memref<1x8x18x4xbf16, #tpu.memory_space<vmem>>, %arg3: memref<1x2x18x4xbf16, #tpu.memory_space<vmem>>, %arg4: memref<16x4x128xbf16, #tpu.memory_space<vmem>>, %arg5: memref<1x128xf32, #tpu.memory_space<vmem>>, %arg6: memref<1x4x8x16x8xbf16, #tpu.memory_space<vmem>>) attributes {dimension_semantics = [#tpu.dimension_semantics<parallel>, #tpu.dimension_semantics<parallel>], iteration_bounds = array<i64: 2, 2>, scalar_prefetch = 0 : i64, scratch_operands = 0 : i64, tpu.core_type = #tpu.core_type<tc>, window_params = [{transform_indices = @transform_0, window_bounds = array<i64: 1, 8, 18, 4>}, {transform_indices = @transform_1, window_bounds = array<i64: 1, 2, 18, 4>}, {pipeline_mode = #tpu.pipeline_mode<synchronous>, transform_indices = @transform_2, window_bounds = array<i64: 16, 4, 128>}, {pipeline_mode = #tpu.pipeline_mode<synchronous>, transform_indices = @transform_3, window_bounds = array<i64: 1, 128>}, {transform_indices = @transform_4, window_bounds = array<i64: 1, 4, 8, 16, 8>}]} {
    %c0 = arith.constant 0 : index
    %c0_0 = arith.constant 0 : index
    %c0_1 = arith.constant 0 : index
    %c0_2 = arith.constant 0 : index
    %0 = vector.load %arg2[%c0, %c0_0, %c0_1, %c0_2] : memref<1x8x18x4xbf16, #tpu.memory_space<vmem>>, vector<1x8x18x4xbf16>
    %1 = vector.shape_cast %0 : vector<1x8x18x4xbf16> to vector<8x18x4xbf16>
    %c0_3 = arith.constant 0 : index
    %c0_4 = arith.constant 0 : index
    %c0_5 = arith.constant 0 : index
    %c0_6 = arith.constant 0 : index
    %2 = vector.load %arg3[%c0_3, %c0_4, %c0_5, %c0_6] : memref<1x2x18x4xbf16, #tpu.memory_space<vmem>>, vector<1x2x18x4xbf16>
    %3 = vector.shape_cast %2 : vector<1x2x18x4xbf16> to vector<2x18x4xbf16>
    %4 = tpu.concatenate %1, %3 in 0 : vector<8x18x4xbf16>, vector<2x18x4xbf16> -> vector<10x18x4xbf16>
    %5 = vector.extract_strided_slice %4 {offsets = [0, 0, 0], sizes = [10, 16, 4], strides = [1, 1, 1]} : vector<10x18x4xbf16> to vector<10x16x4xbf16>
    %6 = vector.extract_strided_slice %4 {offsets = [0, 1, 0], sizes = [10, 16, 4], strides = [1, 1, 1]} : vector<10x18x4xbf16> to vector<10x16x4xbf16>
    %7 = vector.extract_strided_slice %4 {offsets = [0, 2, 0], sizes = [10, 16, 4], strides = [1, 1, 1]} : vector<10x18x4xbf16> to vector<10x16x4xbf16>
    %c0_7 = arith.constant 0 : index
    %c0_8 = arith.constant 0 : index
    %8 = vector.load %arg5[%c0_7, %c0_8] : memref<1x128xf32, #tpu.memory_space<vmem>>, vector<1x128xf32>
    %9 = vector.extract_strided_slice %5 {offsets = [0, 0, 0], sizes = [8, 16, 4], strides = [1, 1, 1]} : vector<10x16x4xbf16> to vector<8x16x4xbf16>
    %10 = vector.shape_cast %9 : vector<8x16x4xbf16> to vector<128x4xbf16>
    %c0_9 = arith.constant 0 : index
    %c0_10 = arith.constant 0 : index
    %c0_11 = arith.constant 0 : index
    %11 = vector.load %arg4[%c0_9, %c0_10, %c0_11] : memref<16x4x128xbf16, #tpu.memory_space<vmem>>, vector<1x4x128xbf16>
    %12 = vector.shape_cast %11 : vector<1x4x128xbf16> to vector<4x128xbf16>
    %cst = arith.constant dense<0.000000e+00> : vector<128x128xf32>
    %13 = tpu.matmul %10, %12, %cst {dimension_numbers = #tpu.dot_dimension_numbers<[1], [0], [0], [1], [0, 0, 1, 1], [], []>} : vector<128x4xbf16>, vector<4x128xbf16>, vector<128x128xf32> -> vector<128x128xf32>
    %14 = vector.extract_strided_slice %6 {offsets = [0, 0, 0], sizes = [8, 16, 4], strides = [1, 1, 1]} : vector<10x16x4xbf16> to vector<8x16x4xbf16>
    %15 = vector.shape_cast %14 : vector<8x16x4xbf16> to vector<128x4xbf16>
    %c1 = arith.constant 1 : index
    %c0_12 = arith.constant 0 : index
    %c0_13 = arith.constant 0 : index
    %16 = vector.load %arg4[%c1, %c0_12, %c0_13] : memref<16x4x128xbf16, #tpu.memory_space<vmem>>, vector<1x4x128xbf16>
    %17 = vector.shape_cast %16 : vector<1x4x128xbf16> to vector<4x128xbf16>
    %cst_14 = arith.constant dense<0.000000e+00> : vector<128x128xf32>
    %18 = tpu.matmul %15, %17, %cst_14 {dimension_numbers = #tpu.dot_dimension_numbers<[1], [0], [0], [1], [0, 0, 1, 1], [], []>} : vector<128x4xbf16>, vector<4x128xbf16>, vector<128x128xf32> -> vector<128x128xf32>
    %19 = arith.addf %13, %18 : vector<128x128xf32>
    %20 = vector.extract_strided_slice %5 {offsets = [1, 0, 0], sizes = [8, 16, 4], strides = [1, 1, 1]} : vector<10x16x4xbf16> to vector<8x16x4xbf16>
    %21 = vector.shape_cast %20 : vector<8x16x4xbf16> to vector<128x4xbf16>
    %c2 = arith.constant 2 : index
    %c0_15 = arith.constant 0 : index
    %c0_16 = arith.constant 0 : index
    %22 = vector.load %arg4[%c2, %c0_15, %c0_16] : memref<16x4x128xbf16, #tpu.memory_space<vmem>>, vector<1x4x128xbf16>
    %23 = vector.shape_cast %22 : vector<1x4x128xbf16> to vector<4x128xbf16>
    %cst_17 = arith.constant dense<0.000000e+00> : vector<128x128xf32>
    %24 = tpu.matmul %21, %23, %cst_17 {dimension_numbers = #tpu.dot_dimension_numbers<[1], [0], [0], [1], [0, 0, 1, 1], [], []>} : vector<128x4xbf16>, vector<4x128xbf16>, vector<128x128xf32> -> vector<128x128xf32>
    %25 = arith.addf %19, %24 : vector<128x128xf32>
    %26 = vector.extract_strided_slice %6 {offsets = [1, 0, 0], sizes = [8, 16, 4], strides = [1, 1, 1]} : vector<10x16x4xbf16> to vector<8x16x4xbf16>
    %27 = vector.shape_cast %26 : vector<8x16x4xbf16> to vector<128x4xbf16>
    %c3 = arith.constant 3 : index
    %c0_18 = arith.constant 0 : index
    %c0_19 = arith.constant 0 : index
    %28 = vector.load %arg4[%c3, %c0_18, %c0_19] : memref<16x4x128xbf16, #tpu.memory_space<vmem>>, vector<1x4x128xbf16>
    %29 = vector.shape_cast %28 : vector<1x4x128xbf16> to vector<4x128xbf16>
    %cst_20 = arith.constant dense<0.000000e+00> : vector<128x128xf32>
    %30 = tpu.matmul %27, %29, %cst_20 {dimension_numbers = #tpu.dot_dimension_numbers<[1], [0], [0], [1], [0, 0, 1, 1], [], []>} : vector<128x4xbf16>, vector<4x128xbf16>, vector<128x128xf32> -> vector<128x128xf32>
    %31 = arith.addf %25, %30 : vector<128x128xf32>
    %32 = vector.broadcast %8 : vector<1x128xf32> to vector<128x128xf32>
    %33 = arith.addf %31, %32 : vector<128x128xf32>
    %cst_21 = arith.constant 0.000000e+00 : f32
    %34 = vector.broadcast %cst_21 : f32 to vector<128x128xf32>
    %35 = arith.maximumf %33, %34 : vector<128x128xf32>
    %36 = vector.extract_strided_slice %35 {offsets = [0, 0], sizes = [128, 8], strides = [1, 1]} : vector<128x128xf32> to vector<128x8xf32>
    %37 = arith.truncf %36 : vector<128x8xf32> to vector<128x8xbf16>
    %38 = vector.shape_cast %37 : vector<128x8xbf16> to vector<8x16x8xbf16>
    %c0_22 = arith.constant 0 : index
    %c0_23 = arith.constant 0 : index
    %c0_24 = arith.constant 0 : index
    %c0_25 = arith.constant 0 : index
    %c0_26 = arith.constant 0 : index
    %39 = vector.load %arg6[%c0_22, %c0_23, %c0_24, %c0_25, %c0_26] : memref<1x4x8x16x8xbf16, #tpu.memory_space<vmem>>, vector<1x1x8x16x8xbf16>
    %40 = vector.shape_cast %39 : vector<1x1x8x16x8xbf16> to vector<8x16x8xbf16>
    %41 = vector.shape_cast %38 : vector<8x16x8xbf16> to vector<1x1x8x16x8xbf16>
    tpu.vector_store %arg6[%c0_22, %c0_23, %c0_24, %c0_25, %c0_26], %41 {strides = array<i32>} : memref<1x4x8x16x8xbf16, #tpu.memory_space<vmem>>, vector<1x1x8x16x8xbf16>,
    %42 = vector.extract_strided_slice %6 {offsets = [0, 0, 0], sizes = [8, 16, 4], strides = [1, 1, 1]} : vector<10x16x4xbf16> to vector<8x16x4xbf16>
    %43 = vector.shape_cast %42 : vector<8x16x4xbf16> to vector<128x4xbf16>
    %c4 = arith.constant 4 : index
    %c0_27 = arith.constant 0 : index
    %c0_28 = arith.constant 0 : index
    %44 = vector.load %arg4[%c4, %c0_27, %c0_28] : memref<16x4x128xbf16, #tpu.memory_space<vmem>>, vector<1x4x128xbf16>
    %45 = vector.shape_cast %44 : vector<1x4x128xbf16> to vector<4x128xbf16>
    %cst_29 = arith.constant dense<0.000000e+00> : vector<128x128xf32>
    %46 = tpu.matmul %43, %45, %cst_29 {dimension_numbers = #tpu.dot_dimension_numbers<[1], [0], [0], [1], [0, 0, 1, 1], [], []>} : vector<128x4xbf16>, vector<4x128xbf16>, vector<128x128xf32> -> vector<128x128xf32>
    %47 = vector.extract_strided_slice %7 {offsets = [0, 0, 0], sizes = [8, 16, 4], strides = [1, 1, 1]} : vector<10x16x4xbf16> to vector<8x16x4xbf16>
    %48 = vector.shape_cast %47 : vector<8x16x4xbf16> to vector<128x4xbf16>
    %c5 = arith.constant 5 : index
    %c0_30 = arith.constant 0 : index
    %c0_31 = arith.constant 0 : index
    %49 = vector.load %arg4[%c5, %c0_30, %c0_31] : memref<16x4x128xbf16, #tpu.memory_space<vmem>>, vector<1x4x128xbf16>
    %50 = vector.shape_cast %49 : vector<1x4x128xbf16> to vector<4x128xbf16>
    %cst_32 = arith.constant dense<0.000000e+00> : vector<128x128xf32>
    %51 = tpu.matmul %48, %50, %cst_32 {dimension_numbers = #tpu.dot_dimension_numbers<[1], [0], [0], [1], [0, 0, 1, 1], [], []>} : vector<128x4xbf16>, vector<4x128xbf16>, vector<128x128xf32> -> vector<128x128xf32>
    %52 = arith.addf %46, %51 : vector<128x128xf32>
    %53 = vector.extract_strided_slice %6 {offsets = [1, 0, 0], sizes = [8, 16, 4], strides = [1, 1, 1]} : vector<10x16x4xbf16> to vector<8x16x4xbf16>
    %54 = vector.shape_cast %53 : vector<8x16x4xbf16> to vector<128x4xbf16>
    %c6 = arith.constant 6 : index
    %c0_33 = arith.constant 0 : index
    %c0_34 = arith.constant 0 : index
    %55 = vector.load %arg4[%c6, %c0_33, %c0_34] : memref<16x4x128xbf16, #tpu.memory_space<vmem>>, vector<1x4x128xbf16>
    %56 = vector.shape_cast %55 : vector<1x4x128xbf16> to vector<4x128xbf16>
    %cst_35 = arith.constant dense<0.000000e+00> : vector<128x128xf32>
    %57 = tpu.matmul %54, %56, %cst_35 {dimension_numbers = #tpu.dot_dimension_numbers<[1], [0], [0], [1], [0, 0, 1, 1], [], []>} : vector<128x4xbf16>, vector<4x128xbf16>, vector<128x128xf32> -> vector<128x128xf32>
    %58 = arith.addf %52, %57 : vector<128x128xf32>
    %59 = vector.extract_strided_slice %7 {offsets = [1, 0, 0], sizes = [8, 16, 4], strides = [1, 1, 1]} : vector<10x16x4xbf16> to vector<8x16x4xbf16>
    %60 = vector.shape_cast %59 : vector<8x16x4xbf16> to vector<128x4xbf16>
    %c7 = arith.constant 7 : index
    %c0_36 = arith.constant 0 : index
    %c0_37 = arith.constant 0 : index
    %61 = vector.load %arg4[%c7, %c0_36, %c0_37] : memref<16x4x128xbf16, #tpu.memory_space<vmem>>, vector<1x4x128xbf16>
    %62 = vector.shape_cast %61 : vector<1x4x128xbf16> to vector<4x128xbf16>
    %cst_38 = arith.constant dense<0.000000e+00> : vector<128x128xf32>
    %63 = tpu.matmul %60, %62, %cst_38 {dimension_numbers = #tpu.dot_dimension_numbers<[1], [0], [0], [1], [0, 0, 1, 1], [], []>} : vector<128x4xbf16>, vector<4x128xbf16>, vector<128x128xf32> -> vector<128x128xf32>
    %64 = arith.addf %58, %63 : vector<128x128xf32>
    %65 = vector.broadcast %8 : vector<1x128xf32> to vector<128x128xf32>
    %66 = arith.addf %64, %65 : vector<128x128xf32>
    %cst_39 = arith.constant 0.000000e+00 : f32
    %67 = vector.broadcast %cst_39 : f32 to vector<128x128xf32>
    %68 = arith.maximumf %66, %67 : vector<128x128xf32>
    %69 = vector.extract_strided_slice %68 {offsets = [0, 0], sizes = [128, 8], strides = [1, 1]} : vector<128x128xf32> to vector<128x8xf32>
    %70 = arith.truncf %69 : vector<128x8xf32> to vector<128x8xbf16>
    %71 = vector.shape_cast %70 : vector<128x8xbf16> to vector<8x16x8xbf16>
    %c0_40 = arith.constant 0 : index
    %c1_41 = arith.constant 1 : index
    %c0_42 = arith.constant 0 : index
    %c0_43 = arith.constant 0 : index
    %c0_44 = arith.constant 0 : index
    %72 = vector.load %arg6[%c0_40, %c1_41, %c0_42, %c0_43, %c0_44] : memref<1x4x8x16x8xbf16, #tpu.memory_space<vmem>>, vector<1x1x8x16x8xbf16>
    %73 = vector.shape_cast %72 : vector<1x1x8x16x8xbf16> to vector<8x16x8xbf16>
    %74 = vector.shape_cast %71 : vector<8x16x8xbf16> to vector<1x1x8x16x8xbf16>
    tpu.vector_store %arg6[%c0_40, %c1_41, %c0_42, %c0_43, %c0_44], %74 {strides = array<i32>} : memref<1x4x8x16x8xbf16, #tpu.memory_space<vmem>>, vector<1x1x8x16x8xbf16>,
    %75 = vector.extract_strided_slice %5 {offsets = [1, 0, 0], sizes = [8, 16, 4], strides = [1, 1, 1]} : vector<10x16x4xbf16> to vector<8x16x4xbf16>
    %76 = vector.shape_cast %75 : vector<8x16x4xbf16> to vector<128x4xbf16>
    %c8 = arith.constant 8 : index
    %c0_45 = arith.constant 0 : index
    %c0_46 = arith.constant 0 : index
    %77 = vector.load %arg4[%c8, %c0_45, %c0_46] : memref<16x4x128xbf16, #tpu.memory_space<vmem>>, vector<1x4x128xbf16>
    %78 = vector.shape_cast %77 : vector<1x4x128xbf16> to vector<4x128xbf16>
    %cst_47 = arith.constant dense<0.000000e+00> : vector<128x128xf32>
    %79 = tpu.matmul %76, %78, %cst_47 {dimension_numbers = #tpu.dot_dimension_numbers<[1], [0], [0], [1], [0, 0, 1, 1], [], []>} : vector<128x4xbf16>, vector<4x128xbf16>, vector<128x128xf32> -> vector<128x128xf32>
    %80 = vector.extract_strided_slice %6 {offsets = [1, 0, 0], sizes = [8, 16, 4], strides = [1, 1, 1]} : vector<10x16x4xbf16> to vector<8x16x4xbf16>
    %81 = vector.shape_cast %80 : vector<8x16x4xbf16> to vector<128x4xbf16>
    %c9 = arith.constant 9 : index
    %c0_48 = arith.constant 0 : index
    %c0_49 = arith.constant 0 : index
    %82 = vector.load %arg4[%c9, %c0_48, %c0_49] : memref<16x4x128xbf16, #tpu.memory_space<vmem>>, vector<1x4x128xbf16>
    %83 = vector.shape_cast %82 : vector<1x4x128xbf16> to vector<4x128xbf16>
    %cst_50 = arith.constant dense<0.000000e+00> : vector<128x128xf32>
    %84 = tpu.matmul %81, %83, %cst_50 {dimension_numbers = #tpu.dot_dimension_numbers<[1], [0], [0], [1], [0, 0, 1, 1], [], []>} : vector<128x4xbf16>, vector<4x128xbf16>, vector<128x128xf32> -> vector<128x128xf32>
    %85 = arith.addf %79, %84 : vector<128x128xf32>
    %86 = vector.extract_strided_slice %5 {offsets = [2, 0, 0], sizes = [8, 16, 4], strides = [1, 1, 1]} : vector<10x16x4xbf16> to vector<8x16x4xbf16>
    %87 = vector.shape_cast %86 : vector<8x16x4xbf16> to vector<128x4xbf16>
    %c10 = arith.constant 10 : index
    %c0_51 = arith.constant 0 : index
    %c0_52 = arith.constant 0 : index
    %88 = vector.load %arg4[%c10, %c0_51, %c0_52] : memref<16x4x128xbf16, #tpu.memory_space<vmem>>, vector<1x4x128xbf16>
    %89 = vector.shape_cast %88 : vector<1x4x128xbf16> to vector<4x128xbf16>
    %cst_53 = arith.constant dense<0.000000e+00> : vector<128x128xf32>
    %90 = tpu.matmul %87, %89, %cst_53 {dimension_numbers = #tpu.dot_dimension_numbers<[1], [0], [0], [1], [0, 0, 1, 1], [], []>} : vector<128x4xbf16>, vector<4x128xbf16>, vector<128x128xf32> -> vector<128x128xf32>
    %91 = arith.addf %85, %90 : vector<128x128xf32>
    %92 = vector.extract_strided_slice %6 {offsets = [2, 0, 0], sizes = [8, 16, 4], strides = [1, 1, 1]} : vector<10x16x4xbf16> to vector<8x16x4xbf16>
    %93 = vector.shape_cast %92 : vector<8x16x4xbf16> to vector<128x4xbf16>
    %c11 = arith.constant 11 : index
    %c0_54 = arith.constant 0 : index
    %c0_55 = arith.constant 0 : index
    %94 = vector.load %arg4[%c11, %c0_54, %c0_55] : memref<16x4x128xbf16, #tpu.memory_space<vmem>>, vector<1x4x128xbf16>
    %95 = vector.shape_cast %94 : vector<1x4x128xbf16> to vector<4x128xbf16>
    %cst_56 = arith.constant dense<0.000000e+00> : vector<128x128xf32>
    %96 = tpu.matmul %93, %95, %cst_56 {dimension_numbers = #tpu.dot_dimension_numbers<[1], [0], [0], [1], [0, 0, 1, 1], [], []>} : vector<128x4xbf16>, vector<4x128xbf16>, vector<128x128xf32> -> vector<128x128xf32>
    %97 = arith.addf %91, %96 : vector<128x128xf32>
    %98 = vector.broadcast %8 : vector<1x128xf32> to vector<128x128xf32>
    %99 = arith.addf %97, %98 : vector<128x128xf32>
    %cst_57 = arith.constant 0.000000e+00 : f32
    %100 = vector.broadcast %cst_57 : f32 to vector<128x128xf32>
    %101 = arith.maximumf %99, %100 : vector<128x128xf32>
    %102 = vector.extract_strided_slice %101 {offsets = [0, 0], sizes = [128, 8], strides = [1, 1]} : vector<128x128xf32> to vector<128x8xf32>
    %103 = arith.truncf %102 : vector<128x8xf32> to vector<128x8xbf16>
    %104 = vector.shape_cast %103 : vector<128x8xbf16> to vector<8x16x8xbf16>
    %c0_58 = arith.constant 0 : index
    %c2_59 = arith.constant 2 : index
    %c0_60 = arith.constant 0 : index
    %c0_61 = arith.constant 0 : index
    %c0_62 = arith.constant 0 : index
    %105 = vector.load %arg6[%c0_58, %c2_59, %c0_60, %c0_61, %c0_62] : memref<1x4x8x16x8xbf16, #tpu.memory_space<vmem>>, vector<1x1x8x16x8xbf16>
    %106 = vector.shape_cast %105 : vector<1x1x8x16x8xbf16> to vector<8x16x8xbf16>
    %107 = vector.shape_cast %104 : vector<8x16x8xbf16> to vector<1x1x8x16x8xbf16>
    tpu.vector_store %arg6[%c0_58, %c2_59, %c0_60, %c0_61, %c0_62], %107 {strides = array<i32>} : memref<1x4x8x16x8xbf16, #tpu.memory_space<vmem>>, vector<1x1x8x16x8xbf16>,
    %108 = vector.extract_strided_slice %6 {offsets = [1, 0, 0], sizes = [8, 16, 4], strides = [1, 1, 1]} : vector<10x16x4xbf16> to vector<8x16x4xbf16>
    %109 = vector.shape_cast %108 : vector<8x16x4xbf16> to vector<128x4xbf16>
    %c12 = arith.constant 12 : index
    %c0_63 = arith.constant 0 : index
    %c0_64 = arith.constant 0 : index
    %110 = vector.load %arg4[%c12, %c0_63, %c0_64] : memref<16x4x128xbf16, #tpu.memory_space<vmem>>, vector<1x4x128xbf16>
    %111 = vector.shape_cast %110 : vector<1x4x128xbf16> to vector<4x128xbf16>
    %cst_65 = arith.constant dense<0.000000e+00> : vector<128x128xf32>
    %112 = tpu.matmul %109, %111, %cst_65 {dimension_numbers = #tpu.dot_dimension_numbers<[1], [0], [0], [1], [0, 0, 1, 1], [], []>} : vector<128x4xbf16>, vector<4x128xbf16>, vector<128x128xf32> -> vector<128x128xf32>
    %113 = vector.extract_strided_slice %7 {offsets = [1, 0, 0], sizes = [8, 16, 4], strides = [1, 1, 1]} : vector<10x16x4xbf16> to vector<8x16x4xbf16>
    %114 = vector.shape_cast %113 : vector<8x16x4xbf16> to vector<128x4xbf16>
    %c13 = arith.constant 13 : index
    %c0_66 = arith.constant 0 : index
    %c0_67 = arith.constant 0 : index
    %115 = vector.load %arg4[%c13, %c0_66, %c0_67] : memref<16x4x128xbf16, #tpu.memory_space<vmem>>, vector<1x4x128xbf16>
    %116 = vector.shape_cast %115 : vector<1x4x128xbf16> to vector<4x128xbf16>
    %cst_68 = arith.constant dense<0.000000e+00> : vector<128x128xf32>
    %117 = tpu.matmul %114, %116, %cst_68 {dimension_numbers = #tpu.dot_dimension_numbers<[1], [0], [0], [1], [0, 0, 1, 1], [], []>} : vector<128x4xbf16>, vector<4x128xbf16>, vector<128x128xf32> -> vector<128x128xf32>
    %118 = arith.addf %112, %117 : vector<128x128xf32>
    %119 = vector.extract_strided_slice %6 {offsets = [2, 0, 0], sizes = [8, 16, 4], strides = [1, 1, 1]} : vector<10x16x4xbf16> to vector<8x16x4xbf16>
    %120 = vector.shape_cast %119 : vector<8x16x4xbf16> to vector<128x4xbf16>
    %c14 = arith.constant 14 : index
    %c0_69 = arith.constant 0 : index
    %c0_70 = arith.constant 0 : index
    %121 = vector.load %arg4[%c14, %c0_69, %c0_70] : memref<16x4x128xbf16, #tpu.memory_space<vmem>>, vector<1x4x128xbf16>
    %122 = vector.shape_cast %121 : vector<1x4x128xbf16> to vector<4x128xbf16>
    %cst_71 = arith.constant dense<0.000000e+00> : vector<128x128xf32>
    %123 = tpu.matmul %120, %122, %cst_71 {dimension_numbers = #tpu.dot_dimension_numbers<[1], [0], [0], [1], [0, 0, 1, 1], [], []>} : vector<128x4xbf16>, vector<4x128xbf16>, vector<128x128xf32> -> vector<128x128xf32>
    %124 = arith.addf %118, %123 : vector<128x128xf32>
    %125 = vector.extract_strided_slice %7 {offsets = [2, 0, 0], sizes = [8, 16, 4], strides = [1, 1, 1]} : vector<10x16x4xbf16> to vector<8x16x4xbf16>
    %126 = vector.shape_cast %125 : vector<8x16x4xbf16> to vector<128x4xbf16>
    %c15 = arith.constant 15 : index
    %c0_72 = arith.constant 0 : index
    %c0_73 = arith.constant 0 : index
    %127 = vector.load %arg4[%c15, %c0_72, %c0_73] : memref<16x4x128xbf16, #tpu.memory_space<vmem>>, vector<1x4x128xbf16>
    %128 = vector.shape_cast %127 : vector<1x4x128xbf16> to vector<4x128xbf16>
    %cst_74 = arith.constant dense<0.000000e+00> : vector<128x128xf32>
    %129 = tpu.matmul %126, %128, %cst_74 {dimension_numbers = #tpu.dot_dimension_numbers<[1], [0], [0], [1], [0, 0, 1, 1], [], []>} : vector<128x4xbf16>, vector<4x128xbf16>, vector<128x128xf32> -> vector<128x128xf32>
    %130 = arith.addf %124, %129 : vector<128x128xf32>
    %131 = vector.broadcast %8 : vector<1x128xf32> to vector<128x128xf32>
    %132 = arith.addf %130, %131 : vector<128x128xf32>
    %cst_75 = arith.constant 0.000000e+00 : f32
    %133 = vector.broadcast %cst_75 : f32 to vector<128x128xf32>
    %134 = arith.maximumf %132, %133 : vector<128x128xf32>
    %135 = vector.extract_strided_slice %134 {offsets = [0, 0], sizes = [128, 8], strides = [1, 1]} : vector<128x128xf32> to vector<128x8xf32>
    %136 = arith.truncf %135 : vector<128x8xf32> to vector<128x8xbf16>
    %137 = vector.shape_cast %136 : vector<128x8xbf16> to vector<8x16x8xbf16>
    %c0_76 = arith.constant 0 : index
    %c3_77 = arith.constant 3 : index
    %c0_78 = arith.constant 0 : index
    %c0_79 = arith.constant 0 : index
    %c0_80 = arith.constant 0 : index
    %138 = vector.load %arg6[%c0_76, %c3_77, %c0_78, %c0_79, %c0_80] : memref<1x4x8x16x8xbf16, #tpu.memory_space<vmem>>, vector<1x1x8x16x8xbf16>
    %139 = vector.shape_cast %138 : vector<1x1x8x16x8xbf16> to vector<8x16x8xbf16>
    %140 = vector.shape_cast %137 : vector<8x16x8xbf16> to vector<1x1x8x16x8xbf16>
    tpu.vector_store %arg6[%c0_76, %c3_77, %c0_78, %c0_79, %c0_80], %140 {strides = array<i32>} : memref<1x4x8x16x8xbf16, #tpu.memory_space<vmem>>, vector<1x1x8x16x8xbf16>,
    return
  }
  func.func @transform_0(%arg0: i32, %arg1: i32) -> (i32, i32, i32, i32) {
    %c0_i32 = arith.constant 0 : i32
    %c0_i32_0 = arith.constant 0 : i32
    %c0_i32_1 = arith.constant 0 : i32
    return %arg0, %arg1, %c0_i32, %c0_i32_0 : i32, i32, i32, i32
  }
  func.func @transform_1(%arg0: i32, %arg1: i32) -> (i32, i32, i32, i32) {
    %c1_i32 = arith.constant 1 : i32
    %0 = arith.addi %arg1, %c1_i32 : i32
    %c4_i32 = arith.constant 4 : i32
    %1 = arith.muli %0, %c4_i32 : i32
    %c0_i32 = arith.constant 0 : i32
    %c0_i32_0 = arith.constant 0 : i32
    %c0_i32_1 = arith.constant 0 : i32
    return %arg0, %1, %c0_i32, %c0_i32_0 : i32, i32, i32, i32
  }
  func.func @transform_2(%arg0: i32, %arg1: i32) -> (i32, i32, i32) {
    %c0_i32 = arith.constant 0 : i32
    %c0_i32_0 = arith.constant 0 : i32
    %c0_i32_1 = arith.constant 0 : i32
    %c0_i32_2 = arith.constant 0 : i32
    return %c0_i32, %c0_i32_0, %c0_i32_1 : i32, i32, i32
  }
  func.func @transform_3(%arg0: i32, %arg1: i32) -> (i32, i32) {
    %c0_i32 = arith.constant 0 : i32
    %c0_i32_0 = arith.constant 0 : i32
    %c0_i32_1 = arith.constant 0 : i32
    return %c0_i32, %c0_i32_0 : i32, i32
  }
  func.func @transform_4(%arg0: i32, %arg1: i32) -> (i32, i32, i32, i32, i32) {
    %c0_i32 = arith.constant 0 : i32
    %c0_i32_0 = arith.constant 0 : i32
    %c0_i32_1 = arith.constant 0 : i32
    %c0_i32_2 = arith.constant 0 : i32
    return %arg0, %c0_i32, %arg1, %c0_i32_0, %c0_i32_1 : i32, i32, i32, i32, i32
  }
}

</mosaic_0001>

<bundles_post_ra>
// kernel: upsample_conv2d_block.1
= control target key start
LH: loop header
LB: loop body
LE: loop exit
PB: predicated region body
PF: predicated region fallthrough
CT: control target
= control target key end

     0   :  { %s2947_s15 = smov 0   ;;  %s2949_s16 = smov 0   ;;  %s3974_s0 = inlined_call_operand.vmem [shape: bf16[2,18,18,4], index: 0, kind: input, shape index: {}, may-alias: {0,1}]   ;;  %s3975_s1 = inlined_call_operand.vmem [shape: bf16[2,18,18,4], index: 1, kind: input, shape index: {}, may-alias: {0,1}]   ;;  %s3976_s2 = inlined_call_operand.vmem [shape: bf16[16,4,128], index: 2, kind: input, shape index: {}]   ;;  %s3977_s3 = inlined_call_operand.vmem [shape: f32[1,128], index: 3, kind: input, shape index: {}]   ;;  %s3978_s4 = inlined_call_operand.vmem [shape: bf16[2,4,16,16,8], index: 4, kind: output, shape index: {}]  }
   0x1   :  { %s2951_s17 = smov 0   ;;  %s2953_s18 = smov 0  }
   0x2   :  { %s2955_s19 = smov 0   ;;  %s2957_s20 = smov 0  }
   0x3   :  { %s2959_s21 = smov 0  }
   0x4 LB: > { %s23_s22 = sadd.s32 1, %s2912_s19  ;;  %s26_s23 = sadd.s32 1, %s2916_s20  ;;  %s2920_s21 = sphi %s2959_s21, %s14_s21   ;;  %s2916_s20 = sphi %s2957_s20, %s3989_s20   ;;  %s2912_s19 = sphi %s2955_s19, %s3988_s19   ;;  %s2908_s18 = sphi %s2953_s18, %s3987_s18   ;;  %s2904_s17 = sphi %s2951_s17, %s3986_s17   ;;  %s2900_s16 = sphi %s2949_s16, %s3985_s16   ;;  %s2896_s15 = sphi %s2947_s15, %s3984_s15  }
   0x5   : > { %p24_p0 = scmp.ge.s32.totalorder %s23_s22, 2  ;;  %s2519_s24 = sadd.s32 4294967295, %s2920_s21  }
   0x6   : > { %p147_p1 = scmp.ne.s32.totalorder %s2900_s16, %s2896_s15  ;;  %p148_p2 = scmp.eq.s32.totalorder %s2519_s24, 3 }
   0x7   : > { %s3991_s22 = smov (%p24_p0, %s23_s22), 0  ;;  %s3993_s23 = smov (!%p24_p0, %s26_s23), %s2916_s20 }
   0x8   : > { %s133_s25 = ssub.s32 %s2912_s19, %s3991_s22  ;;  %p28_p3 = scmp.ge.s32.totalorder %s3993_s23, 2 }
   0x9   : > { %p2525_p4 = scmp.ge.s32.totalorder %s2920_s21, 1  ;;  %p2993_p5 = por %p148_p2, %p147_p1 }
   0xa   : > { %p220_p6 = scmp.lt.s32.totalorder %s2920_s21, 5  ;;  %s3995_s23 = smov (%p28_p3, %s3993_s23), 0 }
   0xb   : > { %s132_s27 = ssub.s32 %s2916_s20, %s3995_s23  ;;  %s137_s29 = sadd.s32 1, %s2900_s16 }
   0xc   : > { %p221_p7 = pnand %p2525_p4, %p220_p6  ;;  %s134_s28 = sor.u32 %s133_s25, %s132_s27 }
   0xd   : > { %p135_p8 = scmp.eq.s32.totalorder %s134_s28, 0  ;;  %s3010_s7 = sshll.u32 (!%p221_p7), %s2904_s17, 3 }
   0xe   : > { %224 = sbr.rel (%p221_p7) target bundleno = 699 (0x2bb), region = 36  ;;  %p273_p9 = scmp.lt.s32.totalorder (!%p221_p7), %s2908_s18, 1 }
   0xf   : > { %s3004_s30 = scalar_select %p135_p8, %s2900_s16, %s137_s29  }
  0x10   : > { %p275_p10 = scmp.lt.s32.totalorder (!%p221_p7), %s3010_s7, 17  ;;  %s2799_s13 = sadd.s32 (!%p221_p7), 8, %s3010_s7 }
  0x11   : > { %p293_p11 = scmp.lt.s32.totalorder (!%p221_p7), %s2799_s13, 17 }
  0x13   : > { %vm583_vm0 = vcmask 1041408   ;;  %v2581_v0 = vld [vmem:[%s3976_s2 + $0x4] sm:$0x3]  ;;  %v336_v2 = vld [vmem:[%s3976_s2] sm:$0x3]  ;;  %s3022_s12 = scalar_select %p273_p9, %s2908_s18, 1 }
  0x14   : > { %v763_v1 = vsel %vm583_vm0, %v2581_v0, 0  ;;  %v2532_v3 = vld [vmem:[%s3976_s2 + $0x2] sm:$0x3]  ;;  %v701_v4 = vsel %vm583_vm0, %v336_v2, 0  ;;  %v2594_v6 = vld [vmem:[%s3976_s2 + $0x6] sm:$0x3] }
  0x15   : > { %772 = vmatpush.bf16.msra.mxu2 %v763_v1  ;;  %v585_v5 = vsel %vm583_vm0, %v2532_v3, 0  ;;  %s276_s24 = scalar_select %p275_p10, %s3010_s7, 17  ;;  %710 = vmatpush.bf16.msra.mxu1 %v701_v4  ;;  %v863_v7 = vsel %vm583_vm0, %v2594_v6, 0  ;;  %v2629_v8 = vld [vmem:[%s3976_s2 + $0xc] sm:$0x3]  ;;  %vm558_vm1 = vcmask 31744  }
  0x16   : > { %594 = vmatpush.bf16.msra.mxu0 %v585_v5  ;;  %s2801_s28 = smul.u32 54, %s3022_s12  ;;  %872 = vmatpush.bf16.msra.mxu3 %v863_v7  ;;  %v1224_v9 = vsel %vm583_vm0, %v2629_v8, 0  ;;  %v2639_v10 = vld [vmem:[%s3976_s2 + $0xe] sm:$0x3]  ;;  %v2612_v12 = vld [vmem:[%s3976_s2 + $0xa] sm:$0x3] }
  0x17   : > { %s2800_s6 = smul.u32 3, %s276_s24  ;;  %v1308_v11 = vsel %vm583_vm0, %v2639_v10, 0  ;;  %v2603_v13 = vld [vmem:[%s3976_s2 + $0x8] sm:$0x3]  ;;  %v1118_v14 = vsel %vm583_vm0, %v2612_v12, 0  ;;  %s3997_s13 = smov (!%p293_p11, %s2799_s13), 17 }
  0x18   : > { %v1170_v15 = vsel %vm583_vm0, %v2603_v13, 0  ;;  %vm337_vm2 = vsmask.f32 3328  ;;  %vm338_vm3 = vsmask.f32 7440  ;;  %s2802_s7 = smul.u32 3, %s3997_s13 }
  0x19   : > { %1233 = vmatpush.bf16.msrb.mxu2 %v1224_v9  ;;  %s279_s14 = sadd.s32 %s2801_s28, %s2800_s6  ;;  %1179 = vmatpush.bf16.msrb.mxu1 %v1170_v15  ;;  %vm3098_vm4 = vmor %vm337_vm2, %vm338_vm3  ;;  %vm1008_vm5 = vcmask 1042432   ;;  %vm1009_vm6 = vcmask 1046532   ;;  %vm981_vm8 = vcmask 60416   ;;  %s2797_s27 = sshll.u32 (%p2993_p5), %s2904_s17, 4 }
  0x1a   : > { %1317 = vmatpush.bf16.msrb.mxu3 %v1308_v11  ;;  %1127 = vmatpush.bf16.msrb.mxu0 %v1118_v14  ;;  %s2528_s24 = sshll.u32 %s279_s14, 2  ;;  %s3108_s5 = sadd.s32 %s2802_s7, %s2801_s28  ;;  %vm3361_vm7 = vmor %vm1008_vm5, %vm1009_vm6 }
  0x1b   : > { %s3054_s29 = scalar_lea.vmem %s3974_s0, %s2528_s24  ;;  %s2531_s12 = sshll.u32 %s3108_s5, 2 }
  0x1c   : > { %v3057_v16 = vld [vmem:[%s3054_s29 + $0xc] sm:$0xff]  ;;  %v2787_v17 = vld [vmem:[%s3054_s29] sm:$0xff]  ;;  %v3069_v20 = vld [vmem:[%s3054_s29 + $0x8] sm:$0x1]  ;;  %s3294_s8 = scalar_lea.vmem %s3975_s1, %s2531_s12  ;;  %s264_s12 = sand.u32 1, %s2896_s15  }
  0x1d   : > { %v3061_v18 = vld [vmem:[%s3054_s29] sm:$0xf]  ;;  %v3066_v19 = vld [vmem:[%s3054_s29 + $0x4] sm:$0xf]  ;;  %2586 = vmatmul.msk.bf16.vlgmr.msra.gmra.mxu2 %vm558_vm1, %v3057_v16  ;;  %2573 = vmatmul.msk.bf16.vlgmr.msra.gmra.mxu1 %vm558_vm1, %v2787_v17  ;;  %v360_v25 = vshll.u32 %v3069_v20, 16  ;;  %v3128_v8 = vld [vmem:[%s3054_s29 + $0x18] sm:$0xff] }
  0x1e   : > { %v341_v21 = vshrl.u32 %v3061_v18, 16  ;;  %v344_v22 = vshll.u32 %v3061_v18, 16  ;;  %v350_v23 = vshll.u32 %v3066_v19, 16  ;;  %v354_v24 = vshrl.u32 %v3066_v19, 16  ;;  %v3080_v26 = vld [vmem:[%s3054_s29 + $0xc] sm:$0xf] }
  0x1f   : > { %v3083_v29 = vld [vmem:[%s3054_s29 + $0x10] sm:$0xf]  ;;  %v3086_v30 = vld [vmem:[%s3054_s29 + $0x14] sm:$0x1]  ;;  %v365_v33 = vshrl.u32 %v3080_v26, 16  ;;  %v368_v35 = vshll.u32 %v3080_v26, 16 }
  0x20   : > { %v343_v27 = vrot.slane %v341_v21, 4  ;;  %v346_v28 = vrot.slane %v344_v22, 5  ;;  %v352_v31 = vrot.slane %v350_v23, 5  ;;  %v356_v32 = vrot.slane %v354_v24, 4  ;;  %v3093_v38 = vld [vmem:[%s3054_s29 + $0x18] sm:$0xf] }
  0x21   : > { %v374_v36 = vshll.u32 %v3083_v29, 16  ;;  %v378_v37 = vshrl.u32 %v3083_v29, 16  ;;  %v362_v41 = vrot.slane %v360_v25, 5  ;;  %v367_v42 = vrot.slane %v365_v33, 4  ;;  %v3104_v44 = vld [vmem:[%s3054_s29 + $0x1c] sm:$0xf] }
  0x22   : > { %v347_v34 = vor.u32 %v346_v28, %v343_v27  ;;  %v357_v40 = vor.u32 %v356_v32, %v352_v31  ;;  %v384_v43 = vshll.u32 %v3086_v30, 16  ;;  %v370_v46 = vrot.slane %v368_v35, 5  ;;  %v3118_v0 = vld [vmem:[%s3054_s29 + $0x20] sm:$0x1]  ;;  %v3142_v21 = vld [vmem:[%s3054_s29 + $0x24] sm:$0xf] }
  0x23   : > { %v376_v47 = vrot.slane %v374_v36, 5  ;;  %v380_v48 = vrot.slane %v378_v37, 4  ;;  %v389_v51 = vshrl.u32 %v3093_v38, 16  ;;  %v392_v52 = vshll.u32 %v3093_v38, 16  ;;  %v3145_v22 = vld [vmem:[%s3054_s29 + $0x28] sm:$0xf] }
  0x24   : > { %v348_v45 = vrot.slane %v347_v34, 4  ;;  %v358_v49 = vrot.slane %v357_v40, 4  ;;  %v386_v50 = vrot.slane %v384_v43, 5  ;;  %v371_v54 = vor.u32 %v370_v46, %v367_v42  ;;  %v3156_v37 = vld [vmem:[%s3054_s29 + $0x2c] sm:$0x1]  ;;  %s2526_s28 = sshll.u32 %s264_s12, 8 }
  0x25   : > { %v381_v55 = vor.u32 %v380_v48, %v376_v47  ;;  %v398_v56 = vshll.u32 %v3104_v44, 16  ;;  %v391_v59 = vrot.slane %v389_v51, 4  ;;  %v394_v63 = vrot.slane %v392_v52, 5  ;;  %s3404_s15 = scalar_lea.vmem [#allocation2], %s2526_s28  ;;  %s2776_s7 = sshll.u32 (%p2993_p5), %s2908_s18, 7 }
  0x26   : > { %v353_v53 = vsel %vm3098_vm4, %v348_v45, %v352_v31  ;;  %v363_v57 = vsel %vm3098_vm4, %v358_v49, %v362_v41  ;;  %v372_v61 = vrot.slane %v371_v54, 4  ;;  %v402_v2 = vshrl.u32 %v3104_v44, 16  ;;  %v3161_v41 = vld [vmem:[%s3054_s29 + $0x24] sm:$0xff]  ;;  %v3173_v49 = vld [vmem:[%s3054_s29 + $0x30] sm:$0xf]  ;;  %s2128_s5 = sadd.s32 (%p2993_p5), %s2797_s27, %s2776_s7 }
  0x27   : > { %v534_v58 = vunpack.c.l.b16 %v353_v53  ;;  %v535_v60 = vunpack.c.l.b16 %v363_v57  ;;  %v382_v62 = vrot.slane %v381_v55, 4  ;;  %v400_v1 = vrot.slane %v398_v56, 5  ;;  %s2777_s12 = sshll.u32 (%p2993_p5), %s2128_s5, 2 }
  0x28   : > { %v377_v4 = vsel %vm3098_vm4, %v372_v61, %v376_v47  ;;  %v404_v9 = vrot.slane %v402_v2, 4  ;;  %v395_v10 = vor.u32 %v394_v63, %v391_v59  ;;  %v408_v11 = vshll.u32 %v3118_v0, 16  ;;  %v3187_v63 = vld [vmem:[%s3054_s29 + $0x38] sm:$0x1]  ;;  %v3192_v2 = vld [vmem:[%s3054_s29 + $0x30] sm:$0xff]  ;;  %s3889_s6 = scalar_lea.vmem (%p2993_p5), %s3978_s4, %s2777_s12 }
  0x29   : > { %v3121_v3 = vpack.c.b16 %v535_v60, %v534_v58  ;;  %v387_v5 = vsel %vm3098_vm4, %v382_v62, %v386_v50  ;;  %v536_v6 = vunpack.c.l.b16 %v377_v4  ;;  %v413_v23 = vshrl.u32 %v3142_v21, 16  ;;  %v3176_v50 = vld [vmem:[%s3054_s29 + $0x34] sm:$0xf] }
  0x2a   : > { %v537_v7 = vunpack.c.l.b16 %v387_v5  ;;  %v405_v13 = vor.u32 %v404_v9, %v400_v1  ;;  %v396_v14 = vrot.slane %v395_v10, 4  ;;  %v410_v17 = vrot.slane %v408_v11, 5  ;;  %v3205_v9 = vld [vmem:[%s3054_s29 + $0x40] sm:$0xf] }
  0x2b   : > { %2533 = vmatmul.msk.bf16.vlgmr.msra.gmra.mxu0 %vm558_vm1, %v3121_v3  ;;  %v416_v24 = vshll.u32 %v3142_v21, 16  ;;  %v426_v28 = vshrl.u32 %v3145_v22, 16  ;;  %v415_v33 = vrot.slane %v413_v23, 4  ;;  %v432_v45 = vshll.u32 %v3156_v37, 16 }
  0x2c   : > { %v3133_v12 = vpack.c.b16 %v537_v7, %v536_v6  ;;  %v406_v15 = vrot.slane %v405_v13, 4  ;;  %v401_v25 = vsel %vm3098_vm4, %v396_v14, %v400_v1  ;;  %v437_v52 = vshrl.u32 %v3173_v49, 16  ;;  %v3202_v7 = vld [vmem:[%s3054_s29 + $0x3c] sm:$0xf] }
  0x2d   : > { %2587 = vmatmul.msk.bf16.gmra.mxu2 %vm558_vm1, %v3128_v8  ;;  %2574 = vmatmul.msk.bf16.gmra.mxu1 %vm558_vm1, %v3057_v16  ;;  %v422_v16 = vshll.u32 %v3145_v22, 16  ;;  %v538_v31 = vunpack.c.l.b16 %v401_v25  ;;  %v418_v34 = vrot.slane %v416_v24, 5  ;;  %v428_v36 = vrot.slane %v426_v28, 4 }
  0x2e   : > { %2595 = vmatmul.msk.bf16.vlgmr.msra.gmra.mxu3 %vm558_vm1, %v3133_v12  ;;  %v411_v27 = vsel %vm3098_vm4, %v406_v15, %v410_v17  ;;  %v434_v48 = vrot.slane %v432_v45, 5  ;;  %v440_v54 = vshll.u32 %v3173_v49, 16  ;;  %v446_v55 = vshll.u32 %v3176_v50, 16  ;;  %v3224_v45 = vld [vmem:[%s3054_s29 + $0x3c] sm:$0xff] }
  0x2f   : > { %v539_v32 = vunpack.c.l.b16 %v411_v27  ;;  %v424_v35 = vrot.slane %v422_v16, 5  ;;  %v419_v42 = vor.u32 %v418_v34, %v415_v33  ;;  %v450_v56 = vshrl.u32 %v3176_v50, 16  ;;  %v3218_v34 = vld [vmem:[%s3054_s29 + $0x44] sm:$0x1] }
  0x30   : > { %v439_v59 = vrot.slane %v437_v52, 4  ;;  %v442_v60 = vrot.slane %v440_v54, 5  ;;  %v448_v61 = vrot.slane %v446_v55, 5  ;;  %v456_v6 = vshll.u32 %v3187_v63, 16  ;;  %v3238_v52 = vld [vmem:[%s3054_s29 + $0x4c] sm:$0xf] }
  0x31   : > { %v3158_v40 = vpack.c.b16 %v539_v32, %v538_v31  ;;  %v429_v43 = vor.u32 %v428_v36, %v424_v35  ;;  %v420_v46 = vrot.slane %v419_v42, 4  ;;  %v452_v62 = vrot.slane %v450_v56, 4 }
  0x32   : > { %v443_v4 = vor.u32 %v442_v60, %v439_v59  ;;  %v458_v13 = vrot.slane %v456_v6, 5  ;;  %v461_v14 = vshrl.u32 %v3202_v7, 16  ;;  %v464_v15 = vshll.u32 %v3202_v7, 16  ;;  %v3249_v6 = vld [vmem:[%s3054_s29 + $0x50] sm:$0x1] }
  0x33   : > { %v430_v47 = vrot.slane %v429_v43, 4  ;;  %v425_v51 = vsel %vm3098_vm4, %v420_v46, %v424_v35  ;;  %v453_v5 = vor.u32 %v452_v62, %v448_v61  ;;  %v470_v17 = vshll.u32 %v3205_v9, 16 }
  0x34   : > { %v540_v57 = vunpack.c.l.b16 %v425_v51  ;;  %v444_v10 = vrot.slane %v443_v4, 4  ;;  %v474_v23 = vshrl.u32 %v3205_v9, 16  ;;  %v463_v27 = vrot.slane %v461_v14, 4  ;;  %v3235_v51 = vld [vmem:[%s3054_s29 + $0x48] sm:$0xf] }
  0x35   : > { %v435_v53 = vsel %vm3098_vm4, %v430_v47, %v434_v48  ;;  %v454_v11 = vrot.slane %v453_v5, 4  ;;  %v466_v16 = vrot.slane %v464_v15, 5  ;;  %v472_v28 = vrot.slane %v470_v17, 5 }
  0x36   : > { %v541_v58 = vunpack.c.l.b16 %v435_v53  ;;  %v449_v24 = vsel %vm3098_vm4, %v444_v10, %v448_v61  ;;  %v476_v31 = vrot.slane %v474_v23, 4  ;;  %v480_v42 = vshll.u32 %v3218_v34, 16 }
  0x37   : > { %v459_v25 = vsel %vm3098_vm4, %v454_v11, %v458_v13  ;;  %v542_v32 = vunpack.c.l.b16 %v449_v24  ;;  %v467_v35 = vor.u32 %v466_v16, %v463_v27  ;;  %v485_v55 = vshrl.u32 %v3235_v51, 16  ;;  %v3254_v11 = vld [vmem:[%s3054_s29 + $0x48] sm:$0xff]  ;;  %v3269_v27 = vld [vmem:[%s3054_s29 + $0x58] sm:$0xf] }
  0x38   : > { %v3189_v1 = vpack.c.b16 %v541_v58, %v540_v57  ;;  %v543_v33 = vunpack.c.l.b16 %v459_v25  ;;  %v477_v36 = vor.u32 %v476_v31, %v472_v28  ;;  %v482_v48 = vrot.slane %v480_v42, 5  ;;  %v3266_v25 = vld [vmem:[%s3054_s29 + $0x54] sm:$0xf] }
  0x39   : > { %v468_v46 = vrot.slane %v467_v35, 4  ;;  %v488_v56 = vshll.u32 %v3235_v51, 16  ;;  %v494_v57 = vshll.u32 %v3238_v52, 16  ;;  %v498_v58 = vshrl.u32 %v3238_v52, 16 }
  0x3a   : > { %v3221_v43 = vpack.c.b16 %v543_v33, %v542_v32  ;;  %v478_v47 = vrot.slane %v477_v36, 4  ;;  %v487_v61 = vrot.slane %v485_v55, 4  ;;  %v504_v15 = vshll.u32 %v3249_v6, 16 }
  0x3b   : > { %2534 = vmatmul.msk.bf16.gmra.mxu0 %vm558_vm1, %v3133_v12  ;;  %v473_v53 = vsel %vm3098_vm4, %v468_v46, %v472_v28  ;;  %v490_v62 = vrot.slane %v488_v56, 5  ;;  %v496_v4 = vrot.slane %v494_v57, 5  ;;  %v500_v5 = vrot.slane %v498_v58, 4  ;;  %v3286_v56 = vld [vmem:[%s3054_s29 + $0x54] sm:$0xff] }
  0x3c   : > { %v483_v54 = vsel %vm3098_vm4, %v478_v47, %v482_v48  ;;  %v544_v59 = vunpack.c.l.b16 %v473_v53  ;;  %v506_v24 = vrot.slane %v504_v15, 5  ;;  %v509_v31 = vshrl.u32 %v3266_v25, 16 }
  0x3d   : > { %2588 = vmatmul.msk.bf16.gmra.mxu2 %vm558_vm1, %v3161_v41  ;;  %2575 = vmatmul.msk.bf16.gmra.mxu1 %vm558_vm1, %v3128_v8  ;;  %v545_v60 = vunpack.c.l.b16 %v483_v54  ;;  %v491_v13 = vor.u32 %v490_v62, %v487_v61  ;;  %v501_v14 = vor.u32 %v500_v5, %v496_v4  ;;  %v512_v32 = vshll.u32 %v3266_v25, 16  ;;  %v3280_v54 = vld [vmem:[%s3054_s29 + $0x5c] sm:$0x1]  ;;  %v3304_v61 = vld [vmem:[%s3294_s8 + $0x4] sm:$0xf] }
  0x3e   : > { %2596 = vmatmul.msk.bf16.gmra.mxu3 %vm558_vm1, %v3158_v40  ;;  %v518_v33 = vshll.u32 %v3269_v27, 16  ;;  %v522_v35 = vshrl.u32 %v3269_v27, 16  ;;  %v511_v46 = vrot.slane %v509_v31, 4  ;;  %v840_v15 = vshll.u32 %v3304_v61, 16 }
  0x3f   : > { %v3251_v10 = vpack.c.b16 %v545_v60, %v544_v59  ;;  %v492_v17 = vrot.slane %v491_v13, 4  ;;  %v502_v23 = vrot.slane %v501_v14, 4  ;;  %v514_v47 = vrot.slane %v512_v32, 5  ;;  %v3301_v60 = vld [vmem:[%s3294_s8] sm:$0xf] }
  0x40   : > { %v520_v48 = vrot.slane %v518_v33, 5  ;;  %v524_v53 = vrot.slane %v522_v35, 4  ;;  %v528_v59 = vshll.u32 %v3280_v54, 16  ;;  %v831_v13 = vshrl.u32 %v3301_v60, 16 }
  0x41   : > { %v497_v16 = vsel %vm3098_vm4, %v492_v17, %v496_v4  ;;  %v507_v28 = vsel %vm3098_vm4, %v502_v23, %v506_v24  ;;  %v515_v57 = vor.u32 %v514_v47, %v511_v46  ;;  %v834_v14 = vshll.u32 %v3301_v60, 16  ;;  %v2682_v47 = vld [vmem:[%s3976_s2 + $0x14] sm:$0x3] }
  0x42   : > { %v546_v36 = vunpack.c.l.b16 %v497_v16  ;;  %v547_v42 = vunpack.c.l.b16 %v507_v28  ;;  %v525_v58 = vor.u32 %v524_v53, %v520_v48  ;;  %v530_v5 = vrot.slane %v528_v59, 5 }
  0x43   : > { %v516_v62 = vrot.slane %v515_v57, 4  ;;  %v844_v17 = vshrl.u32 %v3304_v61, 16  ;;  %v833_v16 = vrot.slane %v831_v13, 4  ;;  %v836_v28 = vrot.slane %v834_v14, 5  ;;  %v2664_v13 = vld [vmem:[%s3976_s2 + $0x10] sm:$0x3] }
  0x44   : > { %v3283_v55 = vpack.c.b16 %v547_v42, %v546_v36  ;;  %v526_v4 = vrot.slane %v525_v58, 4  ;;  %v842_v31 = vrot.slane %v840_v15, 5  ;;  %v3317_v36 = vld [vmem:[%s3294_s8 + $0x8] sm:$0x1]  ;;  %v1559_v57 = vsel %vm583_vm0, %v2682_v47, 0 }
  0x45   : > { %v521_v23 = vsel %vm3098_vm4, %v516_v62, %v520_v48  ;;  %v846_v32 = vrot.slane %v844_v17, 4  ;;  %v837_v42 = vor.u32 %v836_v28, %v833_v16  ;;  %v3325_v48 = vld [vmem:[%s3294_s8] sm:$0xff]  ;;  %v850_v58 = vshll.u32 %v3317_v36, 16  ;;  %1568 = vmatpush.bf16.msra.mxu2 %v1559_v57 }
  0x46   : > { %v531_v24 = vsel %vm3098_vm4, %v526_v4, %v530_v5  ;;  %v548_v33 = vunpack.c.l.b16 %v521_v23  ;;  %v2695_v4 = vld [vmem:[%s3976_s2 + $0x16] sm:$0x3]  ;;  %v2665_v5 = vld [vmem:[%s3976_s2 + $0x12] sm:$0x3]  ;;  %v1497_v23 = vsel %vm583_vm0, %v2664_v13, 0  ;;  %v1016_v47 = vrot.slane %v3069_v20, 5 }
  0x47   : > { %v549_v35 = vunpack.c.l.b16 %v531_v24  ;;  %v847_v46 = vor.u32 %v846_v32, %v842_v31  ;;  %v838_v59 = vrot.slane %v837_v42, 4  ;;  %v852_v14 = vrot.slane %v850_v58, 5  ;;  %1506 = vmatpush.bf16.msra.mxu1 %v1497_v23 }
  0x48   : > { %v1659_v15 = vsel %vm583_vm0, %v2695_v4, 0  ;;  %v1445_v17 = vsel %vm583_vm0, %v2665_v5, 0  ;;  %v1023_v20 = vrot.slane %v3086_v30, 5 }
  0x49   : > { %v3322_v53 = vpack.c.b16 %v549_v35, %v548_v33  ;;  %v848_v62 = vrot.slane %v847_v46, 4  ;;  %1668 = vmatpush.bf16.msra.mxu3 %v1659_v15  ;;  %1454 = vmatpush.bf16.msra.mxu0 %v1445_v17  ;;  %v843_v24 = vsel %vm3098_vm4, %v838_v59, %v842_v31  ;;  %v1013_v33 = vrot.slane %v3066_v19, 5 }
  0x4a   : > { %v856_v28 = vunpack.c.l.b16 %v843_v24  ;;  %v1020_v46 = vrot.slane %v3083_v29, 5  ;;  %v2604_v31 = vrot.slane %v3061_v18, 9  ;;  %v2605_v19 = vrot.slane %v3080_v26, 9 }
  0x4b   : > { %2535 = vmatmul.msk.bf16.gmra.mxu0 %vm558_vm1, %v3158_v40  ;;  %v853_v16 = vsel %vm3098_vm4, %v848_v62, %v852_v14  ;;  %v1015_v57 = vrot.slane %v1013_v33, 4 }
  0x4c   : > { %v857_v32 = vunpack.c.l.b16 %v853_v16  ;;  %v1022_v29 = vrot.slane %v1020_v46, 4  ;;  %v1014_v18 = vsel %vm3361_vm7, %v2604_v31, %v1013_v33  ;;  %v1021_v14 = vsel %vm3361_vm7, %v2605_v19, %v1020_v46 }
  0x4d   : > { %2589 = vmatmul.msk.bf16.gmra.mxu2 %vm558_vm1, %v3192_v2  ;;  %2576 = vmatmul.msk.bf16.gmra.mxu1 %vm558_vm1, %v3161_v41  ;;  %v1017_v59 = vsel %vm3361_vm7, %v1015_v57, %v1016_v47  ;;  %v1069_v5 = vunpack.c.l.b16 %v1014_v18  ;;  %v1071_v26 = vunpack.c.l.b16 %v1021_v14  ;;  %v2606_v46 = vrot.slane %v3093_v38, 9 }
  0x4e   : > { %2597 = vmatmul.msk.bf16.gmra.mxu3 %vm558_vm1, %v3189_v1  ;;  %v3354_v35 = vpack.c.b16 %v857_v32, %v856_v28  ;;  %v1070_v13 = vunpack.c.l.b16 %v1017_v59  ;;  %v1027_v28 = vrot.slane %v3104_v44, 5  ;;  %v1030_v47 = vrot.slane %v3118_v0, 5  ;;  %v3396_v44 = vld [vmem:[%s3977_s3] ss:$0 sm:$0xff] }
  0x50   : > { %v1085_v17 = vpack.c.b16 %v1070_v13, %v1069_v5 }
  0x5b   : > { %2536 = vmatmul.msk.bf16.gmra.mxu0 %vm558_vm1, %v3189_v1 }
  0x5d   : > { %2590 = vmatmul.msk.bf16.gmra.mxu2 %vm558_vm1, %v3224_v45  ;;  %2577 = vmatmul.msk.bf16.gmra.mxu1 %vm558_vm1, %v3192_v2 }
  0x5e   : > { %2598 = vmatmul.msk.bf16.gmra.mxu3 %vm558_vm1, %v3221_v43 }
  0x6b   : > { %2537 = vmatmul.msk.bf16.gmra.mxu0 %vm558_vm1, %v3221_v43 }
  0x6d   : > { %2591 = vmatmul.msk.bf16.gmra.mxu2 %vm558_vm1, %v3254_v11  ;;  %2578 = vmatmul.msk.bf16.gmra.mxu1 %vm558_vm1, %v3224_v45 }
  0x6e   : > { %2599 = vmatmul.msk.bf16.gmra.mxu3 %vm558_vm1, %v3251_v10 }
  0x7b   : > { %2538 = vmatmul.msk.bf16.gmra.mxu0 %vm558_vm1, %v3251_v10 }
  0x7d   : > { %2592 = vmatmul.msk.bf16.gmra.mxu2 %vm558_vm1, %v3286_v56  ;;  %2579 = vmatmul.msk.bf16.gmra.mxu1 %vm558_vm1, %v3254_v11 }
  0x7e   : > { %2600 = vmatmul.msk.bf16.gmra.mxu3 %vm558_vm1, %v3283_v55 }
  0x8b   : > { %2539 = vmatmul.msk.bf16.gmra.mxu0 %vm558_vm1, %v3283_v55 }
  0x8d   : > { %2593 = vmatmul.msk.bf16.gmra.mxu2 %vm558_vm1, %v3325_v48  ;;  %2580 = vmatmul.msk.bf16.gmra.mxu1 %vm558_vm1, %v3286_v56 }
  0x8e   : > { %2601 = vmatmul.msk.bf16.gmra.mxu3 %vm558_vm1, %v3322_v53 }
  0x9a   : > { %v712_v42 = vpop.f32.mrf.mxu1 }
  0x9b   : > { %2540 = vmatmul.msk.bf16.gmra.mxu0 %vm558_vm1, %v3322_v53 }
  0x9d   : > { %2630 = vmatmul.msk.bf16.vlgmr.msrb.gmra.mxu2 %vm558_vm1, %v3133_v12  ;;  %2621 = vmatmul.msk.bf16.vlgmr.msrb.gmra.mxu1 %vm558_vm1, %v3121_v3  ;;  %v1024_v3 = vsel %vm3361_vm7, %v1022_v29, %v1023_v20  ;;  %v1028_v20 = vsel %vm3361_vm7, %v2606_v46, %v1027_v28 }
  0x9e   : > { %2602 = vmatmul.msk.bf16.gmra.mxu3 %vm558_vm1, %v3354_v35  ;;  %v1072_v15 = vunpack.c.l.b16 %v1024_v3  ;;  %v1073_v5 = vunpack.c.l.b16 %v1028_v20 }
  0xa0   : > { %v774_v62 = vpop.f32.mrf.mxu2  ;;  %v3381_v16 = vpack.c.b16 %v1072_v15, %v1071_v26 }
  0xa2   : > { %v714_v4 = vpop.f32.mrf.mxu1 }
  0xa8   : > { %v596_v30 = vpop.f32.mrf.mxu0  ;;  %v776_v23 = vpop.f32.mrf.mxu2 }
  0xa9   : > { %v713_v24 = vadd.f32 %v712_v42, %v596_v30  ;;  %v1029_v42 = vrot.slane %v1027_v28, 4 }
  0xaa   : > { %v717_v32 = vpop.f32.mrf.mxu1 }
  0xab   : > { %2613 = vmatmul.msk.bf16.vlgmr.msrb.gmra.mxu0 %vm558_vm1, %v1085_v17  ;;  %v814_v33 = vadd.f32 %v774_v62, %v713_v24  ;;  %v1031_v18 = vsel %vm3361_vm7, %v1029_v42, %v1030_v47 }
  0xac   : > { %v1074_v13 = vunpack.c.l.b16 %v1031_v18 }
  0xad   : > { %2631 = vmatmul.msk.bf16.gmra.mxu2 %vm558_vm1, %v3158_v40  ;;  %2622 = vmatmul.msk.bf16.gmra.mxu1 %vm558_vm1, %v3133_v12 }
  0xae   : > { %2640 = vmatmul.msk.bf16.vlgmr.msrb.gmra.mxu3 %vm558_vm1, %v3381_v16  ;;  %v3408_v28 = vpack.c.b16 %v1074_v13, %v1073_v5 }
  0xb0   : > { %v598_v31 = vpop.f32.mrf.mxu0  ;;  %v779_v19 = vpop.f32.mrf.mxu2 }
  0xb1   : > { %v874_v57 = vpop.f32.mrf.mxu3  ;;  %v715_v0 = vadd.f32 %v714_v4, %v598_v31  ;;  %v1034_v4 = vrot.slane %v3145_v22, 5  ;;  %v1037_v31 = vrot.slane %v3156_v37, 5 }
  0xb2   : > { %v914_v29 = vadd.f32 %v874_v57, %v814_v33  ;;  %v719_v59 = vpop.f32.mrf.mxu1 }
  0xb3   : > { %v815_v3 = vadd.f32 %v776_v23, %v715_v0  ;;  %v1036_v47 = vrot.slane %v1034_v4, 4 }
  0xb4   : > { %v933_v38 = vadd.f32 %v3396_v44, %v914_v29 }
  0xb6   : > { %v949_v62 = vmax.f32 %v933_v38, 0.0  ;;  %v1038_v38 = vsel %vm3361_vm7, %v1036_v47, %v1037_v31  ;;  %v1044_v31 = vrot.slane %v3187_v63, 5 }
  0xb7   : > { %v1076_v13 = vunpack.c.l.b16 %v1038_v38 }
  0xb8   : > { %v965_v14 = vpack.c.bf16 %v949_v62, %v949_v62  ;;  %v601_v26 = vpop.f32.mrf.mxu0  ;;  %v781_v17 = vpop.f32.mrf.mxu2 }
  0xb9   : > { %v876_v15 = vpop.f32.mrf.mxu3  ;;  %v718_v24 = vadd.f32 %v717_v32, %v601_v26  ;;  %v2607_v32 = vrot.slane %v3142_v21, 9 }
  0xba   : > { %982 = vst.msk [vmem:[%s3404_s15] sm:$0xf] %vm981_vm8, %v965_v14  ;;  %v915_v30 = vadd.f32 %v876_v15, %v815_v3  ;;  %v722_v33 = vpop.f32.mrf.mxu1 }
  0xbb   : > { %2614 = vmatmul.msk.bf16.gmra.mxu0 %vm558_vm1, %v3381_v16  ;;  %v816_v42 = vadd.f32 %v779_v19, %v718_v24  ;;  %v1035_v19 = vsel %vm3361_vm7, %v2607_v32, %v1034_v4 }
  0xbc   : > { %v934_v23 = vadd.f32 %v3396_v44, %v915_v30  ;;  %v1075_v37 = vunpack.c.l.b16 %v1035_v19 }
  0xbd   : > { %2632 = vmatmul.msk.bf16.gmra.mxu2 %vm558_vm1, %v3189_v1  ;;  %2623 = vmatmul.msk.bf16.gmra.mxu1 %vm558_vm1, %v3158_v40 }
  0xbe   : > { %v950_v46 = vmax.f32 %v934_v23, 0.0  ;;  %2641 = vmatmul.msk.bf16.gmra.mxu3 %vm558_vm1, %v3408_v28  ;;  %v3431_v4 = vpack.c.b16 %v1076_v13, %v1075_v37 }
  0xc0   : > { %v966_v22 = vpack.c.bf16 %v950_v46, %v950_v46  ;;  %v603_v57 = vpop.f32.mrf.mxu0  ;;  %v784_v20 = vpop.f32.mrf.mxu2 }
  0xc1   : > { %v879_v29 = vpop.f32.mrf.mxu3  ;;  %v720_v21 = vadd.f32 %v719_v59, %v603_v57  ;;  %v1041_v59 = vrot.slane %v3176_v50, 5 }
  0xc2   : > { %983 = vst.msk [vmem:[%s3404_s15 + $0x4] sm:$0xf] %vm981_vm8, %v966_v22  ;;  %v916_v18 = vadd.f32 %v879_v29, %v816_v42  ;;  %v724_v62 = vpop.f32.mrf.mxu1 }
  0xc3   : > { %v817_v3 = vadd.f32 %v781_v17, %v720_v21  ;;  %v1043_v47 = vrot.slane %v1041_v59, 4 }
  0xc4   : > { %v935_v0 = vadd.f32 %v3396_v44, %v916_v18 }
  0xc5   : > { %v1045_v19 = vsel %vm3361_vm7, %v1043_v47, %v1044_v31 }
  0xc6   : > { %v951_v5 = vmax.f32 %v935_v0, 0.0 }
  0xc8   : > { %v967_v14 = vpack.c.bf16 %v951_v5, %v951_v5  ;;  %v606_v26 = vpop.f32.mrf.mxu0  ;;  %v786_v30 = vpop.f32.mrf.mxu2  ;;  %v1078_v5 = vunpack.c.l.b16 %v1045_v19 }
  0xc9   : > { %v881_v15 = vpop.f32.mrf.mxu3  ;;  %v723_v23 = vadd.f32 %v722_v33, %v606_v26  ;;  %v2608_v33 = vrot.slane %v3173_v49, 9 }
  0xca   : > { %984 = vst.msk [vmem:[%s3404_s15 + $0x8] sm:$0xf] %vm981_vm8, %v967_v14  ;;  %v917_v24 = vadd.f32 %v881_v15, %v817_v3  ;;  %v727_v42 = vpop.f32.mrf.mxu1 }
  0xcb   : > { %2615 = vmatmul.msk.bf16.gmra.mxu0 %vm558_vm1, %v3408_v28  ;;  %v818_v17 = vadd.f32 %v784_v20, %v723_v23  ;;  %v1042_v20 = vsel %vm3361_vm7, %v2608_v33, %v1041_v59  ;;  %v1051_v33 = vrot.slane %v3218_v34, 5 }
  0xcc   : > { %v936_v46 = vadd.f32 %v3396_v44, %v917_v24  ;;  %v1077_v63 = vunpack.c.l.b16 %v1042_v20 }
  0xcd   : > { %2633 = vmatmul.msk.bf16.gmra.mxu2 %vm558_vm1, %v3221_v43  ;;  %2624 = vmatmul.msk.bf16.gmra.mxu1 %vm558_vm1, %v3189_v1 }
  0xce   : > { %v952_v32 = vmax.f32 %v936_v46, 0.0  ;;  %2642 = vmatmul.msk.bf16.gmra.mxu3 %vm558_vm1, %v3431_v4  ;;  %v3454_v23 = vpack.c.b16 %v1078_v5, %v1077_v63 }
  0xd0   : > { %v968_v50 = vpack.c.bf16 %v952_v32, %v952_v32  ;;  %v608_v22 = vpop.f32.mrf.mxu0  ;;  %v789_v29 = vpop.f32.mrf.mxu2 }
  0xd1   : > { %v884_v57 = vpop.f32.mrf.mxu3  ;;  %v725_v49 = vadd.f32 %v724_v62, %v608_v22  ;;  %v1048_v62 = vrot.slane %v3205_v9, 5 }
  0xd2   : > { %985 = vst.msk [vmem:[%s3404_s15 + $0xc] sm:$0xf] %vm981_vm8, %v968_v50  ;;  %v918_v18 = vadd.f32 %v884_v57, %v818_v17  ;;  %v729_v0 = vpop.f32.mrf.mxu1 }
  0xd3   : > { %v819_v13 = vadd.f32 %v786_v30, %v725_v49  ;;  %v1050_v17 = vrot.slane %v1048_v62, 4 }
  0xd4   : > { %v937_v38 = vadd.f32 %v3396_v44, %v918_v18 }
  0xd6   : > { %v953_v21 = vmax.f32 %v937_v38, 0.0 }
  0xd8   : > { %v969_v37 = vpack.c.bf16 %v953_v21, %v953_v21  ;;  %v611_v14 = vpop.f32.mrf.mxu0  ;;  %v791_v26 = vpop.f32.mrf.mxu2 }
  0xd9   : > { %v886_v3 = vpop.f32.mrf.mxu3  ;;  %v728_v24 = vadd.f32 %v727_v42, %v611_v14  ;;  %v2609_v42 = vrot.slane %v3202_v7, 9 }
  0xda   : > { %986 = vst.msk [vmem:[%s3404_s15 + $0x10] sm:$0xf] %vm981_vm8, %v969_v37  ;;  %v919_v15 = vadd.f32 %v886_v3, %v819_v13  ;;  %v732_v46 = vpop.f32.mrf.mxu1 }
  0xdb   : > { %2616 = vmatmul.msk.bf16.gmra.mxu0 %vm558_vm1, %v3431_v4  ;;  %v820_v30 = vadd.f32 %v789_v29, %v728_v24  ;;  %v1049_v57 = vsel %vm3361_vm7, %v2609_v42, %v1048_v62  ;;  %v1052_v29 = vsel %vm3361_vm7, %v1050_v17, %v1051_v33 }
  0xdc   : > { %v938_v59 = vadd.f32 %v3396_v44, %v919_v15  ;;  %v1079_v34 = vunpack.c.l.b16 %v1049_v57  ;;  %v1080_v38 = vunpack.c.l.b16 %v1052_v29 }
  0xdd   : > { %2634 = vmatmul.msk.bf16.gmra.mxu2 %vm558_vm1, %v3251_v10  ;;  %2625 = vmatmul.msk.bf16.gmra.mxu1 %vm558_vm1, %v3221_v43 }
  0xde   : > { %v954_v32 = vmax.f32 %v938_v59, 0.0  ;;  %2643 = vmatmul.msk.bf16.gmra.mxu3 %vm558_vm1, %v3454_v23  ;;  %v3477_v3 = vpack.c.b16 %v1080_v38, %v1079_v34  ;;  %v2610_v59 = vrot.slane %v3235_v51, 9 }
  0xe0   : > { %v970_v9 = vpack.c.bf16 %v954_v32, %v954_v32  ;;  %v613_v47 = vpop.f32.mrf.mxu0  ;;  %v794_v50 = vpop.f32.mrf.mxu2  ;;  %v1058_v32 = vrot.slane %v3249_v6, 5 }
  0xe1   : > { %v889_v31 = vpop.f32.mrf.mxu3  ;;  %v730_v7 = vadd.f32 %v729_v0, %v613_v47  ;;  %v1055_v0 = vrot.slane %v3238_v52, 5 }
  0xe2   : > { %987 = vst.msk [vmem:[%s3404_s15 + $0x14] sm:$0xf] %vm981_vm8, %v970_v9  ;;  %v920_v22 = vadd.f32 %v889_v31, %v820_v30  ;;  %v734_v20 = vpop.f32.mrf.mxu1 }
  0xe3   : > { %v821_v21 = vadd.f32 %v791_v26, %v730_v7  ;;  %v1056_v9 = vsel %vm3361_vm7, %v2610_v59, %v1055_v0 }
  0xe4   : > { %v939_v18 = vadd.f32 %v3396_v44, %v920_v22  ;;  %v1081_v6 = vunpack.c.l.b16 %v1056_v9 }
  0xe6   : > { %v955_v19 = vmax.f32 %v939_v18, 0.0 }
  0xe8   : > { %v971_v49 = vpack.c.bf16 %v955_v19, %v955_v19  ;;  %v616_v63 = vpop.f32.mrf.mxu0  ;;  %v796_v37 = vpop.f32.mrf.mxu2 }
  0xe9   : > { %v891_v5 = vpop.f32.mrf.mxu3  ;;  %v733_v14 = vadd.f32 %v732_v46, %v616_v63  ;;  %v1057_v46 = vrot.slane %v1055_v0, 4 }
  0xea   : > { %988 = vst.msk [vmem:[%s3404_s15 + $0x18] sm:$0xf] %vm981_vm8, %v971_v49  ;;  %v921_v13 = vadd.f32 %v891_v5, %v821_v21  ;;  %v737_v24 = vpop.f32.mrf.mxu1 }
  0xeb   : > { %2617 = vmatmul.msk.bf16.gmra.mxu0 %vm558_vm1, %v3454_v23  ;;  %v822_v26 = vadd.f32 %v794_v50, %v733_v14  ;;  %v1059_v47 = vsel %vm3361_vm7, %v1057_v46, %v1058_v32  ;;  %v2611_v14 = vrot.slane %v3266_v25, 9 }
  0xec   : > { %v940_v15 = vadd.f32 %v3396_v44, %v921_v13  ;;  %v1082_v57 = vunpack.c.l.b16 %v1059_v47 }
  0xed   : > { %2635 = vmatmul.msk.bf16.gmra.mxu2 %vm558_vm1, %v3283_v55  ;;  %2626 = vmatmul.msk.bf16.gmra.mxu1 %vm558_vm1, %v3251_v10 }
  0xee   : > { %v956_v62 = vmax.f32 %v940_v15, 0.0  ;;  %2644 = vmatmul.msk.bf16.gmra.mxu3 %vm558_vm1, %v3477_v3  ;;  %v3500_v21 = vpack.c.b16 %v1082_v57, %v1081_v6  ;;  %v1065_v15 = vrot.slane %v3280_v54, 5 }
  0xf0   : > { %v972_v52 = vpack.c.bf16 %v956_v62, %v956_v62  ;;  %v618_v30 = vpop.f32.mrf.mxu0  ;;  %v799_v17 = vpop.f32.mrf.mxu2 }
  0xf1   : > { %v894_v42 = vpop.f32.mrf.mxu3  ;;  %v735_v51 = vadd.f32 %v734_v20, %v618_v30  ;;  %v1062_v20 = vrot.slane %v3269_v27, 5 }
  0xf2   : > { %989 = vst.msk [vmem:[%s3404_s15 + $0x1c] sm:$0xf] %vm981_vm8, %v972_v52  ;;  %v922_v33 = vadd.f32 %v894_v42, %v822_v26  ;;  %v739_v50 = vpop.f32.mrf.mxu1 }
  0xf3   : > { %v823_v18 = vadd.f32 %v796_v37, %v735_v51  ;;  %v1064_v0 = vrot.slane %v1062_v20, 4  ;;  %v1063_v46 = vsel %vm3361_vm7, %v2611_v14, %v1062_v20  ;;  %v2748_v14 = vld [vmem:[%s3976_s2 + $0x1e] sm:$0x3] }
  0xf4   : > { %v941_v31 = vadd.f32 %v3396_v44, %v922_v33  ;;  %v1083_v54 = vunpack.c.l.b16 %v1063_v46 }
  0xf5   : > { %v1066_v32 = vsel %vm3361_vm7, %v1064_v0, %v1065_v15  ;;  %v1986_v15 = vsel %vm583_vm0, %v2748_v14, 0 }
  0xf6   : > { %v957_v22 = vmax.f32 %v941_v31, 0.0  ;;  %1995 = vmatpush.bf16.msrb.mxu3 %v1986_v15 }
  0xf8   : > { %v973_v29 = vpack.c.bf16 %v957_v22, %v957_v22  ;;  %v621_v7 = vpop.f32.mrf.mxu0  ;;  %v801_v34 = vpop.f32.mrf.mxu2 }
  0xf9   : > { %v896_v19 = vpop.f32.mrf.mxu3  ;;  %v738_v49 = vadd.f32 %v737_v24, %v621_v7 }
  0xfa   : > { %990 = vst.msk [vmem:[%s3404_s15 + $0x20] sm:$0xf] %vm981_vm8, %v973_v29  ;;  %v923_v38 = vadd.f32 %v896_v19, %v823_v18  ;;  %v742_v5 = vpop.f32.mrf.mxu1 }
  0xfb   : > { %2618 = vmatmul.msk.bf16.gmra.mxu0 %vm558_vm1, %v3477_v3  ;;  %v824_v37 = vadd.f32 %v799_v17, %v738_v49  ;;  %v1084_v17 = vunpack.c.l.b16 %v1066_v32  ;;  %v1297_v49 = vrot.slane %v3317_v36, 5 }
  0xfc   : > { %v942_v63 = vadd.f32 %v3396_v44, %v923_v38 }
  0xfd   : > { %2636 = vmatmul.msk.bf16.gmra.mxu2 %vm558_vm1, %v3322_v53  ;;  %2627 = vmatmul.msk.bf16.gmra.mxu1 %vm558_vm1, %v3283_v55  ;;  %v3523_v57 = vpack.c.b16 %v1084_v17, %v1083_v54 }
  0xfe   : > { %v958_v13 = vmax.f32 %v942_v63, 0.0  ;;  %2645 = vmatmul.msk.bf16.gmra.mxu3 %vm558_vm1, %v3500_v21 }
 0x100   : > { %v974_v27 = vpack.c.bf16 %v958_v13, %v958_v13  ;;  %v623_v24 = vpop.f32.mrf.mxu0  ;;  %v804_v26 = vpop.f32.mrf.mxu2 }
 0x101   : > { %v899_v62 = vpop.f32.mrf.mxu3  ;;  %v740_v25 = vadd.f32 %v739_v50, %v623_v24  ;;  %v1294_v50 = vrot.slane %v3304_v61, 5  ;;  %v2720_v24 = vld [vmem:[%s3976_s2 + $0x18] sm:$0x3] }
 0x102   : > { %991 = vst.msk [vmem:[%s3404_s15 + $0x24] sm:$0xf] %vm981_vm8, %v974_v27  ;;  %v924_v59 = vadd.f32 %v899_v62, %v824_v37  ;;  %v744_v30 = vpop.f32.mrf.mxu1  ;;  %v2738_v37 = vld [vmem:[%s3976_s2 + $0x1c] sm:$0x3]  ;;  %v2721_v27 = vld [vmem:[%s3976_s2 + $0x1a] sm:$0x3] }
 0x103   : > { %v825_v9 = vadd.f32 %v801_v34, %v740_v25  ;;  %v2638_v34 = vrot.slane %v3301_v60, 9  ;;  %v1296_v38 = vrot.slane %v1294_v50, 4  ;;  %v1902_v0 = vsel %vm583_vm0, %v2738_v37, 0 }
 0x104   : > { %v943_v52 = vadd.f32 %v3396_v44, %v924_v59  ;;  %1911 = vmatpush.bf16.msrb.mxu2 %v1902_v0  ;;  %v1796_v46 = vsel %vm583_vm0, %v2721_v27, 0  ;;  %v1848_v32 = vsel %vm583_vm0, %v2720_v24, 0 }
 0x105   : > { %v1295_v60 = vsel %vm3361_vm7, %v2638_v34, %v1294_v50  ;;  %v1298_v36 = vsel %vm3361_vm7, %v1296_v38, %v1297_v49  ;;  %1805 = vmatpush.bf16.msrb.mxu0 %v1796_v46  ;;  %1857 = vmatpush.bf16.msrb.mxu1 %v1848_v32 }
 0x106   : > { %v959_v42 = vmax.f32 %v943_v52, 0.0  ;;  %v1301_v25 = vunpack.c.l.b16 %v1295_v60 }
 0x108   : > { %v975_v33 = vpack.c.bf16 %v959_v42, %v959_v42  ;;  %v626_v47 = vpop.f32.mrf.mxu0  ;;  %v806_v51 = vpop.f32.mrf.mxu2  ;;  %v1302_v42 = vunpack.c.l.b16 %v1298_v36 }
 0x109   : > { %v901_v31 = vpop.f32.mrf.mxu3  ;;  %v743_v6 = vadd.f32 %v742_v5, %v626_v47 }
 0x10a   : > { %992 = vst.msk [vmem:[%s3404_s15 + $0x28] sm:$0xf] %vm981_vm8, %v975_v33  ;;  %v925_v22 = vadd.f32 %v901_v31, %v825_v9  ;;  %v747_v18 = vpop.f32.mrf.mxu1 }
 0x10b   : > { %2619 = vmatmul.msk.bf16.gmra.mxu0 %vm558_vm1, %v3500_v21  ;;  %v826_v19 = vadd.f32 %v804_v26, %v743_v6 }
 0x10c   : > { %v944_v29 = vadd.f32 %v3396_v44, %v925_v22  ;;  %v3562_v22 = vpack.c.b16 %v1302_v42, %v1301_v25 }
 0x10d   : > { %2637 = vmatmul.msk.bf16.gmra.mxu2 %vm558_vm1, %v3354_v35  ;;  %2628 = vmatmul.msk.bf16.gmra.mxu1 %vm558_vm1, %v3322_v53 }
 0x10e   : > { %v960_v7 = vmax.f32 %v944_v29, 0.0  ;;  %2646 = vmatmul.msk.bf16.gmra.mxu3 %vm558_vm1, %v3523_v57 }
 0x110   : > { %v976_v61 = vpack.c.bf16 %v960_v7, %v960_v7  ;;  %v628_v20 = vpop.f32.mrf.mxu0  ;;  %v809_v5 = vpop.f32.mrf.mxu2  ;;  %v2860_v7 = vld [vmem:[%s3054_s29 + $0xc] sm:$0xff] }
 0x111   : > { %v904_v63 = vpop.f32.mrf.mxu3  ;;  %v745_v26 = vadd.f32 %v744_v30, %v628_v20 }
 0x112   : > { %993 = vst.msk [vmem:[%s3404_s15 + $0x2c] sm:$0xf] %vm981_vm8, %v976_v61  ;;  %v926_v13 = vadd.f32 %v904_v63, %v826_v19  ;;  %v749_v59 = vpop.f32.mrf.mxu1 }
 0x113   : > { %v827_v17 = vadd.f32 %v806_v51, %v745_v26  ;;  %v2861_v26 = vld [vmem:[%s3054_s29 + $0x18] sm:$0xff] }
 0x114   : > { %v945_v62 = vadd.f32 %v3396_v44, %v926_v13 }
 0x116   : > { %v961_v52 = vmax.f32 %v945_v62, 0.0 }
 0x118   : > { %v977_v54 = vpack.c.bf16 %v961_v52, %v961_v52  ;;  %v631_v33 = vpop.f32.mrf.mxu0  ;;  %v811_v47 = vpop.f32.mrf.mxu2 }
 0x119   : > { %v906_v9 = vpop.f32.mrf.mxu3  ;;  %v748_v31 = vadd.f32 %v747_v18, %v631_v33 }
 0x11a   : > { %994 = vst.msk [vmem:[%s3404_s15 + $0x30] sm:$0xf] %vm981_vm8, %v977_v54  ;;  %v927_v30 = vadd.f32 %v906_v9, %v827_v17  ;;  %v1181_v50 = vpop.f32.mrf.mxu1 }
 0x11b   : > { %2620 = vmatmul.msk.bf16.gmra.mxu0 %vm558_vm1, %v3523_v57  ;;  %v828_v51 = vadd.f32 %v809_v5, %v748_v31 }
 0x11c   : > { %v946_v6 = vadd.f32 %v3396_v44, %v927_v30 }
 0x11d   : > { %2687 = vmatmul.msk.bf16.vlgmr.msra.gmra.mxu2 %vm558_vm1, %v3128_v8  ;;  %2674 = vmatmul.msk.bf16.vlgmr.msra.gmra.mxu1 %vm558_vm1, %v2860_v7 }
 0x11e   : > { %v962_v29 = vmax.f32 %v946_v6, 0.0  ;;  %2647 = vmatmul.msk.bf16.gmra.mxu3 %vm558_vm1, %v3562_v22 }
 0x120   : > { %v978_v18 = vpack.c.bf16 %v962_v29, %v962_v29  ;;  %v633_v19 = vpop.f32.mrf.mxu0  ;;  %v1235_v38 = vpop.f32.mrf.mxu2 }
 0x121   : > { %v909_v34 = vpop.f32.mrf.mxu3  ;;  %v750_v20 = vadd.f32 %v749_v59, %v633_v19  ;;  %v2862_v19 = vld [vmem:[%s3054_s29 + $0x24] sm:$0xff] }
 0x122   : > { %995 = vst.msk [vmem:[%s3404_s15 + $0x34] sm:$0xf] %vm981_vm8, %v978_v18  ;;  %v928_v49 = vadd.f32 %v909_v34, %v828_v51  ;;  %v1183_v63 = vpop.f32.mrf.mxu1 }
 0x123   : > { %v829_v37 = vadd.f32 %v811_v47, %v750_v20 }
 0x124   : > { %v947_v61 = vadd.f32 %v3396_v44, %v928_v49 }
 0x126   : > { %v963_v13 = vmax.f32 %v947_v61, 0.0 }
 0x128   : > { %v979_v5 = vpack.c.bf16 %v963_v13, %v963_v13  ;;  %v1129_v8 = vpop.f32.mrf.mxu0  ;;  %v1237_v60 = vpop.f32.mrf.mxu2 }
 0x129   : > { %v911_v14 = vpop.f32.mrf.mxu3  ;;  %v1182_v0 = vadd.f32 %v1181_v50, %v1129_v8 }
 0x12a   : > { %996 = vst.msk [vmem:[%s3404_s15 + $0x38] sm:$0xf] %vm981_vm8, %v979_v5  ;;  %v929_v36 = vadd.f32 %v911_v14, %v829_v37  ;;  %v1186_v27 = vpop.f32.mrf.mxu1 }
 0x12b   : > { %2666 = vmatmul.msk.bf16.vlgmr.msra.gmra.mxu0 %vm558_vm1, %v3133_v12  ;;  %v1275_v62 = vadd.f32 %v1235_v38, %v1182_v0 }
 0x12c   : > { %v948_v15 = vadd.f32 %v3396_v44, %v929_v36 }
 0x12d   : > { %2688 = vmatmul.msk.bf16.gmra.mxu2 %vm558_vm1, %v3161_v41  ;;  %2675 = vmatmul.msk.bf16.gmra.mxu1 %vm558_vm1, %v2861_v26 }
 0x12e   : > { %v964_v24 = vmax.f32 %v948_v15, 0.0  ;;  %2696 = vmatmul.msk.bf16.vlgmr.msra.gmra.mxu3 %vm558_vm1, %v3158_v40 }
 0x130   : > { %v980_v59 = vpack.c.bf16 %v964_v24, %v964_v24  ;;  %v1131_v46 = vpop.f32.mrf.mxu0  ;;  %v1240_v52 = vpop.f32.mrf.mxu2 }
 0x131   : > { %v1319_v32 = vpop.f32.mrf.mxu3  ;;  %v1184_v54 = vadd.f32 %v1183_v63, %v1131_v46 }
 0x132   : > { %997 = vst.msk [vmem:[%s3404_s15 + $0x3c] sm:$0xf] %vm981_vm8, %v980_v59  ;;  %v1359_v25 = vadd.f32 %v1319_v32, %v1275_v62  ;;  %v1188_v17 = vpop.f32.mrf.mxu1  ;;  %v2863_v59 = vld [vmem:[%s3054_s29 + $0x30] sm:$0xff] }
 0x133   : > { %v1276_v47 = vadd.f32 %v1237_v60, %v1184_v54 }
 0x134   : > { %v1375_v42 = vadd.f32 %v3396_v44, %v1359_v25 }
 0x136   : > { %v1391_v33 = vmax.f32 %v1375_v42, 0.0 }
 0x138   : > { %v1407_v9 = vpack.c.bf16 %v1391_v33, %v1391_v33  ;;  %v1134_v41 = vpop.f32.mrf.mxu0  ;;  %v1242_v31 = vpop.f32.mrf.mxu2 }
 0x139   : > { %v1321_v30 = vpop.f32.mrf.mxu3  ;;  %v1187_v50 = vadd.f32 %v1186_v27, %v1134_v41 }
 0x13a   : > { %2648 = vst.msk [vmem:[%s3404_s15 + $0x40] sm:$0xf] %vm981_vm8, %v1407_v9  ;;  %v1360_v6 = vadd.f32 %v1321_v30, %v1276_v47  ;;  %v1191_v51 = vpop.f32.mrf.mxu1 }
 0x13b   : > { %2667 = vmatmul.msk.bf16.gmra.mxu0 %vm558_vm1, %v3158_v40  ;;  %v1277_v18 = vadd.f32 %v1240_v52, %v1187_v50 }
 0x13c   : > { %v1376_v29 = vadd.f32 %v3396_v44, %v1360_v6 }
 0x13d   : > { %2689 = vmatmul.msk.bf16.gmra.mxu2 %vm558_vm1, %v3192_v2  ;;  %2676 = vmatmul.msk.bf16.gmra.mxu1 %vm558_vm1, %v2862_v19 }
 0x13e   : > { %v1392_v7 = vmax.f32 %v1376_v29, 0.0  ;;  %2697 = vmatmul.msk.bf16.gmra.mxu3 %vm558_vm1, %v3189_v1 }
 0x140   : > { %v1408_v34 = vpack.c.bf16 %v1392_v7, %v1392_v7  ;;  %v1136_v38 = vpop.f32.mrf.mxu0  ;;  %v1245_v61 = vpop.f32.mrf.mxu2 }
 0x141   : > { %v1324_v49 = vpop.f32.mrf.mxu3  ;;  %v1189_v13 = vadd.f32 %v1188_v17, %v1136_v38 }
 0x142   : > { %2649 = vst.msk [vmem:[%s3404_s15 + $0x44] sm:$0xf] %vm981_vm8, %v1408_v34  ;;  %v1361_v20 = vadd.f32 %v1324_v49, %v1277_v18  ;;  %v1193_v5 = vpop.f32.mrf.mxu1 }
 0x143   : > { %v1278_v14 = vadd.f32 %v1242_v31, %v1189_v13 }
 0x144   : > { %v1377_v63 = vadd.f32 %v3396_v44, %v1361_v20 }
 0x146   : > { %v1393_v37 = vmax.f32 %v1377_v63, 0.0 }
 0x148   : > { %v1409_v8 = vpack.c.bf16 %v1393_v37, %v1393_v37  ;;  %v1139_v2 = vpop.f32.mrf.mxu0  ;;  %v1247_v36 = vpop.f32.mrf.mxu2 }
 0x149   : > { %v1326_v60 = vpop.f32.mrf.mxu3  ;;  %v1192_v15 = vadd.f32 %v1191_v51, %v1139_v2 }
 0x14a   : > { %2650 = vst.msk [vmem:[%s3404_s15 + $0x48] sm:$0xf] %vm981_vm8, %v1409_v8  ;;  %v1362_v0 = vadd.f32 %v1326_v60, %v1278_v14  ;;  %v1196_v24 = vpop.f32.mrf.mxu1 }
 0x14b   : > { %2668 = vmatmul.msk.bf16.gmra.mxu0 %vm558_vm1, %v3189_v1  ;;  %v1279_v26 = vadd.f32 %v1245_v61, %v1192_v15 }
 0x14c   : > { %v1378_v27 = vadd.f32 %v3396_v44, %v1362_v0 }
 0x14d   : > { %2690 = vmatmul.msk.bf16.gmra.mxu2 %vm558_vm1, %v3224_v45  ;;  %2677 = vmatmul.msk.bf16.gmra.mxu1 %vm558_vm1, %v2863_v59 }
 0x14e   : > { %v1394_v62 = vmax.f32 %v1378_v27, 0.0  ;;  %2698 = vmatmul.msk.bf16.gmra.mxu3 %vm558_vm1, %v3221_v43 }
 0x150   : > { %v1410_v46 = vpack.c.bf16 %v1394_v62, %v1394_v62  ;;  %v1141_v32 = vpop.f32.mrf.mxu0  ;;  %v1250_v25 = vpop.f32.mrf.mxu2 }
 0x151   : > { %v1329_v52 = vpop.f32.mrf.mxu3  ;;  %v1194_v17 = vadd.f32 %v1193_v5, %v1141_v32 }
 0x152   : > { %2651 = vst.msk [vmem:[%s3404_s15 + $0x4c] sm:$0xf] %vm981_vm8, %v1410_v46  ;;  %v1363_v42 = vadd.f32 %v1329_v52, %v1279_v26  ;;  %v1198_v33 = vpop.f32.mrf.mxu1 }
 0x153   : > { %v1280_v41 = vadd.f32 %v1247_v36, %v1194_v17 }
 0x154   : > { %v1379_v54 = vadd.f32 %v3396_v44, %v1363_v42 }
 0x156   : > { %v1395_v9 = vmax.f32 %v1379_v54, 0.0 }
 0x158   : > { %v1411_v47 = vpack.c.bf16 %v1395_v9, %v1395_v9  ;;  %v1144_v30 = vpop.f32.mrf.mxu0  ;;  %v1252_v6 = vpop.f32.mrf.mxu2 }
 0x159   : > { %v1331_v31 = vpop.f32.mrf.mxu3  ;;  %v1197_v29 = vadd.f32 %v1196_v24, %v1144_v30 }
 0x15a   : > { %2652 = vst.msk [vmem:[%s3404_s15 + $0x50] sm:$0xf] %vm981_vm8, %v1411_v47  ;;  %v1364_v50 = vadd.f32 %v1331_v31, %v1280_v41  ;;  %v1201_v7 = vpop.f32.mrf.mxu1 }
 0x15b   : > { %2669 = vmatmul.msk.bf16.gmra.mxu0 %vm558_vm1, %v3221_v43  ;;  %v1281_v19 = vadd.f32 %v1250_v25, %v1197_v29 }
 0x15c   : > { %v1380_v51 = vadd.f32 %v3396_v44, %v1364_v50 }
 0x15d   : > { %2691 = vmatmul.msk.bf16.gmra.mxu2 %vm558_vm1, %v3254_v11  ;;  %2678 = vmatmul.msk.bf16.gmra.mxu1 %vm558_vm1, %v3224_v45 }
 0x15e   : > { %v1396_v18 = vmax.f32 %v1380_v51, 0.0  ;;  %2699 = vmatmul.msk.bf16.gmra.mxu3 %vm558_vm1, %v3251_v10 }
 0x160   : > { %v1412_v34 = vpack.c.bf16 %v1396_v18, %v1396_v18  ;;  %v1146_v38 = vpop.f32.mrf.mxu0  ;;  %v1255_v61 = vpop.f32.mrf.mxu2 }
 0x161   : > { %v1334_v49 = vpop.f32.mrf.mxu3  ;;  %v1199_v13 = vadd.f32 %v1198_v33, %v1146_v38 }
 0x162   : > { %2653 = vst.msk [vmem:[%s3404_s15 + $0x54] sm:$0xf] %vm981_vm8, %v1412_v34  ;;  %v1365_v20 = vadd.f32 %v1334_v49, %v1281_v19  ;;  %v1203_v5 = vpop.f32.mrf.mxu1  ;;  %v3658_v19 = vld [vmem:[%s3294_s8 + $0xc] sm:$0xf]  ;;  %v3661_v34 = vld [vmem:[%s3294_s8 + $0x10] sm:$0xf] }
 0x163   : > { %v1282_v14 = vadd.f32 %v1252_v6, %v1199_v13 }
 0x164   : > { %v1381_v63 = vadd.f32 %v3396_v44, %v1365_v20  ;;  %v1627_v20 = vshrl.u32 %v3658_v19, 16 }
 0x166   : > { %v1397_v37 = vmax.f32 %v1381_v63, 0.0  ;;  %v1630_v63 = vshll.u32 %v3658_v19, 16 }
 0x168   : > { %v1413_v8 = vpack.c.bf16 %v1397_v37, %v1397_v37  ;;  %v1149_v2 = vpop.f32.mrf.mxu0  ;;  %v1257_v36 = vpop.f32.mrf.mxu2 }
 0x169   : > { %v1336_v60 = vpop.f32.mrf.mxu3  ;;  %v1202_v0 = vadd.f32 %v1201_v7, %v1149_v2  ;;  %v1632_v2 = vrot.slane %v1630_v63, 5 }
 0x16a   : > { %2654 = vst.msk [vmem:[%s3404_s15 + $0x58] sm:$0xf] %vm981_vm8, %v1413_v8  ;;  %v1366_v45 = vadd.f32 %v1336_v60, %v1282_v14  ;;  %v1206_v27 = vpop.f32.mrf.mxu1  ;;  %v1629_v14 = vrot.slane %v1627_v20, 4 }
 0x16b   : > { %2670 = vmatmul.msk.bf16.gmra.mxu0 %vm558_vm1, %v3251_v10  ;;  %v1283_v62 = vadd.f32 %v1255_v61, %v1202_v0 }
 0x16c   : > { %v1382_v15 = vadd.f32 %v3396_v44, %v1366_v45 }
 0x16d   : > { %2692 = vmatmul.msk.bf16.gmra.mxu2 %vm558_vm1, %v3286_v56  ;;  %2679 = vmatmul.msk.bf16.gmra.mxu1 %vm558_vm1, %v3254_v11 }
 0x16e   : > { %v1398_v24 = vmax.f32 %v1382_v15, 0.0  ;;  %2700 = vmatmul.msk.bf16.gmra.mxu3 %vm558_vm1, %v3283_v55 }
 0x170   : > { %v1414_v26 = vpack.c.bf16 %v1398_v24, %v1398_v24  ;;  %v1151_v59 = vpop.f32.mrf.mxu0  ;;  %v1260_v32 = vpop.f32.mrf.mxu2 }
 0x171   : > { %v1339_v46 = vpop.f32.mrf.mxu3  ;;  %v1204_v42 = vadd.f32 %v1203_v5, %v1151_v59 }
 0x172   : > { %2655 = vst.msk [vmem:[%s3404_s15 + $0x5c] sm:$0xf] %vm981_vm8, %v1414_v26  ;;  %v1367_v52 = vadd.f32 %v1339_v46, %v1283_v62  ;;  %v1208_v54 = vpop.f32.mrf.mxu1  ;;  %v2796_v46 = vld [vmem:[%s3294_s8 + $0xc] sm:$0xff] }
 0x173   : > { %v1284_v9 = vadd.f32 %v1257_v36, %v1204_v42 }
 0x174   : > { %v1383_v25 = vadd.f32 %v3396_v44, %v1367_v52 }
 0x176   : > { %v1399_v17 = vmax.f32 %v1383_v25, 0.0 }
 0x178   : > { %v1415_v33 = vpack.c.bf16 %v1399_v17, %v1399_v17  ;;  %v1154_v47 = vpop.f32.mrf.mxu0  ;;  %v1262_v11 = vpop.f32.mrf.mxu2 }
 0x179   : > { %v1341_v41 = vpop.f32.mrf.mxu3  ;;  %v1207_v31 = vadd.f32 %v1206_v27, %v1154_v47  ;;  %v3671_v27 = vld [vmem:[%s3294_s8 + $0x14] sm:$0x1] }
 0x17a   : > { %2656 = vst.msk [vmem:[%s3404_s15 + $0x60] sm:$0xf] %vm981_vm8, %v1415_v33  ;;  %v1368_v30 = vadd.f32 %v1341_v41, %v1284_v9  ;;  %v1211_v50 = vpop.f32.mrf.mxu1  ;;  %v1646_v25 = vshll.u32 %v3671_v27, 16  ;;  %v2864_v9 = vld [vmem:[%s3294_s8] sm:$0xff] }
 0x17b   : > { %2671 = vmatmul.msk.bf16.gmra.mxu0 %vm558_vm1, %v3283_v55  ;;  %v1285_v51 = vadd.f32 %v1260_v32, %v1207_v31  ;;  %v1633_v32 = vor.u32 %v1632_v2, %v1629_v14 }
 0x17c   : > { %v1384_v6 = vadd.f32 %v3396_v44, %v1368_v30 }
 0x17d   : > { %2693 = vmatmul.msk.bf16.gmra.mxu2 %vm558_vm1, %v3325_v48  ;;  %2680 = vmatmul.msk.bf16.gmra.mxu1 %vm558_vm1, %v3286_v56  ;;  %v1636_v48 = vshll.u32 %v3661_v34, 16  ;;  %v1640_v56 = vshrl.u32 %v3661_v34, 16  ;;  %v1634_v47 = vrot.slane %v1633_v32, 4 }
 0x17e   : > { %v1400_v29 = vmax.f32 %v1384_v6, 0.0  ;;  %2701 = vmatmul.msk.bf16.gmra.mxu3 %vm558_vm1, %v3322_v53 }
 0x17f   : > { %v1638_v60 = vrot.slane %v1636_v48, 5  ;;  %v1642_v36 = vrot.slane %v1640_v56, 4 }
 0x180   : > { %v1416_v7 = vpack.c.bf16 %v1400_v29, %v1400_v29  ;;  %v1156_v18 = vpop.f32.mrf.mxu0  ;;  %v1265_v49 = vpop.f32.mrf.mxu2 }
 0x181   : > { %v1344_v38 = vpop.f32.mrf.mxu3  ;;  %v1209_v5 = vadd.f32 %v1208_v54, %v1156_v18  ;;  %v1643_v52 = vor.u32 %v1642_v36, %v1638_v60 }
 0x182   : > { %2657 = vst.msk [vmem:[%s3404_s15 + $0x64] sm:$0xf] %vm981_vm8, %v1416_v7  ;;  %v1369_v61 = vadd.f32 %v1344_v38, %v1285_v51  ;;  %v1213_v37 = vpop.f32.mrf.mxu1  ;;  %v1639_v51 = vsel %vm3098_vm4, %v1634_v47, %v1638_v60 }
 0x183   : > { %v1286_v0 = vadd.f32 %v1262_v11, %v1209_v5  ;;  %v1644_v41 = vrot.slane %v1643_v52, 4  ;;  %v1648_v11 = vrot.slane %v1646_v25, 5  ;;  %v1652_v20 = vunpack.c.l.b16 %v1639_v51 }
 0x184   : > { %v1385_v13 = vadd.f32 %v3396_v44, %v1369_v61 }
 0x185   : > { %v1649_v7 = vsel %vm3098_vm4, %v1644_v41, %v1648_v11 }
 0x186   : > { %v1401_v8 = vmax.f32 %v1385_v13, 0.0  ;;  %v1653_v63 = vunpack.c.l.b16 %v1649_v7 }
 0x188   : > { %v1417_v45 = vpack.c.bf16 %v1401_v8, %v1401_v8  ;;  %v1159_v15 = vpop.f32.mrf.mxu0  ;;  %v1267_v62 = vpop.f32.mrf.mxu2  ;;  %v3694_v60 = vpack.c.b16 %v1653_v63, %v1652_v20 }
 0x189   : > { %v1346_v24 = vpop.f32.mrf.mxu3  ;;  %v1212_v59 = vadd.f32 %v1211_v50, %v1159_v15 }
 0x18a   : > { %2658 = vst.msk [vmem:[%s3404_s15 + $0x68] sm:$0xf] %vm981_vm8, %v1417_v45  ;;  %v1370_v26 = vadd.f32 %v1346_v24, %v1286_v0  ;;  %v1216_v54 = vpop.f32.mrf.mxu1 }
 0x18b   : > { %2672 = vmatmul.msk.bf16.gmra.mxu0 %vm558_vm1, %v3322_v53  ;;  %v1287_v33 = vadd.f32 %v1265_v49, %v1212_v59 }
 0x18c   : > { %v1386_v42 = vadd.f32 %v3396_v44, %v1370_v26 }
 0x18d   : > { %2694 = vmatmul.msk.bf16.gmra.mxu2 %vm558_vm1, %v2796_v46  ;;  %2681 = vmatmul.msk.bf16.gmra.mxu1 %vm558_vm1, %v2864_v9 }
 0x18e   : > { %v1402_v17 = vmax.f32 %v1386_v42, 0.0  ;;  %2702 = vmatmul.msk.bf16.gmra.mxu3 %vm558_vm1, %v3354_v35 }
 0x190   : > { %v1418_v30 = vpack.c.bf16 %v1402_v17, %v1402_v17  ;;  %v1161_v31 = vpop.f32.mrf.mxu0  ;;  %v1270_v50 = vpop.f32.mrf.mxu2 }
 0x191   : > { %v1349_v6 = vpop.f32.mrf.mxu3  ;;  %v1214_v38 = vadd.f32 %v1213_v37, %v1161_v31 }
 0x192   : > { %2659 = vst.msk [vmem:[%s3404_s15 + $0x6c] sm:$0xf] %vm981_vm8, %v1418_v30  ;;  %v1371_v29 = vadd.f32 %v1349_v6, %v1287_v33  ;;  %v1218_v49 = vpop.f32.mrf.mxu1 }
 0x193   : > { %v1288_v56 = vadd.f32 %v1267_v62, %v1214_v38 }
 0x194   : > { %v1387_v18 = vadd.f32 %v3396_v44, %v1371_v29 }
 0x196   : > { %v1403_v61 = vmax.f32 %v1387_v18, 0.0 }
 0x198   : > { %v1419_v48 = vpack.c.bf16 %v1403_v61, %v1403_v61  ;;  %v1164_v13 = vpop.f32.mrf.mxu0  ;;  %v1272_v8 = vpop.f32.mrf.mxu2 }
 0x199   : > { %v1351_v5 = vpop.f32.mrf.mxu3  ;;  %v1217_v2 = vadd.f32 %v1216_v54, %v1164_v13 }
 0x19a   : > { %2660 = vst.msk [vmem:[%s3404_s15 + $0x70] sm:$0xf] %vm981_vm8, %v1419_v48  ;;  %v1372_v14 = vadd.f32 %v1351_v5, %v1288_v56  ;;  %v1508_v37 = vpop.f32.mrf.mxu1 }
 0x19b   : > { %2673 = vmatmul.msk.bf16.gmra.mxu0 %vm558_vm1, %v3354_v35  ;;  %v1289_v45 = vadd.f32 %v1270_v50, %v1217_v2 }
 0x19c   : > { %v1388_v39 = vadd.f32 %v3396_v44, %v1372_v14 }
 0x19d   : > { %2739 = vmatmul.msk.bf16.vlgmr.msrb.gmra.mxu2 %vm558_vm1, %v3158_v40  ;;  %2730 = vmatmul.msk.bf16.vlgmr.msrb.gmra.mxu1 %vm558_vm1, %v3133_v12 }
 0x19e   : > { %v1404_v36 = vmax.f32 %v1388_v39, 0.0  ;;  %2703 = vmatmul.msk.bf16.gmra.mxu3 %vm558_vm1, %v3694_v60 }
 0x1a0   : > { %v1420_v0 = vpack.c.bf16 %v1404_v36, %v1404_v36  ;;  %v1166_v15 = vpop.f32.mrf.mxu0  ;;  %v1570_v62 = vpop.f32.mrf.mxu2 }
 0x1a1   : > { %v1354_v24 = vpop.f32.mrf.mxu3  ;;  %v1219_v46 = vadd.f32 %v1218_v49, %v1166_v15 }
 0x1a2   : > { %2661 = vst.msk [vmem:[%s3404_s15 + $0x74] sm:$0xf] %vm981_vm8, %v1420_v0  ;;  %v1373_v26 = vadd.f32 %v1354_v24, %v1289_v45  ;;  %v1510_v32 = vpop.f32.mrf.mxu1 }
 0x1a3   : > { %v1290_v42 = vadd.f32 %v1272_v8, %v1219_v46 }
 0x1a4   : > { %v1389_v59 = vadd.f32 %v3396_v44, %v1373_v26 }
 0x1a6   : > { %v1405_v52 = vmax.f32 %v1389_v59, 0.0 }
 0x1a8   : > { %v1421_v25 = vpack.c.bf16 %v1405_v52, %v1405_v52  ;;  %v1456_v54 = vpop.f32.mrf.mxu0  ;;  %v1572_v33 = vpop.f32.mrf.mxu2 }
 0x1a9   : > { %v1356_v17 = vpop.f32.mrf.mxu3  ;;  %v1509_v9 = vadd.f32 %v1508_v37, %v1456_v54 }
 0x1aa   : > { %2662 = vst.msk [vmem:[%s3404_s15 + $0x78] sm:$0xf] %vm981_vm8, %v1421_v25  ;;  %v1374_v12 = vadd.f32 %v1356_v17, %v1290_v42  ;;  %v1513_v41 = vpop.f32.mrf.mxu1 }
 0x1ab   : > { %2722 = vmatmul.msk.bf16.vlgmr.msrb.gmra.mxu0 %vm558_vm1, %v3381_v16  ;;  %v1610_v30 = vadd.f32 %v1570_v62, %v1509_v9 }
 0x1ac   : > { %v1390_v47 = vadd.f32 %v3396_v44, %v1374_v12  ;;  %v3724_v44 = vld [vmem:[%s3977_s3] ss:$0 sm:$0xff] }
 0x1ad   : > { %2740 = vmatmul.msk.bf16.gmra.mxu2 %vm558_vm1, %v3189_v1  ;;  %2731 = vmatmul.msk.bf16.gmra.mxu1 %vm558_vm1, %v3158_v40 }
 0x1ae   : > { %v1406_v11 = vmax.f32 %v1390_v47, 0.0  ;;  %2749 = vmatmul.msk.bf16.vlgmr.msrb.gmra.mxu3 %vm558_vm1, %v3408_v28 }
 0x1b0   : > { %v1422_v31 = vpack.c.bf16 %v1406_v11, %v1406_v11  ;;  %v1458_v6 = vpop.f32.mrf.mxu0  ;;  %v1575_v29 = vpop.f32.mrf.mxu2 }
 0x1b1   : > { %v1670_v50 = vpop.f32.mrf.mxu3  ;;  %v1511_v7 = vadd.f32 %v1510_v32, %v1458_v6 }
 0x1b2   : > { %2663 = vst.msk [vmem:[%s3404_s15 + $0x7c] sm:$0xf] %vm981_vm8, %v1422_v31  ;;  %v1710_v16 = vadd.f32 %v1670_v50, %v1610_v30  ;;  %v1515_v18 = vpop.f32.mrf.mxu1 }
 0x1b3   : > { %v1611_v40 = vadd.f32 %v1572_v33, %v1511_v7 }
 0x1b4   : > { %v1726_v51 = vadd.f32 %v3724_v44, %v1710_v16 }
 0x1b6   : > { %v1742_v38 = vmax.f32 %v1726_v51, 0.0 }
 0x1b8   : > { %v1758_v49 = vpack.c.bf16 %v1742_v38, %v1742_v38  ;;  %v1461_v61 = vpop.f32.mrf.mxu0  ;;  %v1577_v63 = vpop.f32.mrf.mxu2 }
 0x1b9   : > { %v1672_v20 = vpop.f32.mrf.mxu3  ;;  %v1514_v56 = vadd.f32 %v1513_v41, %v1461_v61 }
 0x1ba   : > { %2704 = vst.msk [vmem:[%s3404_s15 + $0x80] sm:$0xf] %vm981_vm8, %v1758_v49  ;;  %v1711_v48 = vadd.f32 %v1672_v20, %v1611_v40  ;;  %v1518_v5 = vpop.f32.mrf.mxu1 }
 0x1bb   : > { %2723 = vmatmul.msk.bf16.gmra.mxu0 %vm558_vm1, %v3408_v28  ;;  %v1612_v14 = vadd.f32 %v1575_v29, %v1514_v56 }
 0x1bc   : > { %v1727_v13 = vadd.f32 %v3724_v44, %v1711_v48 }
 0x1bd   : > { %2741 = vmatmul.msk.bf16.gmra.mxu2 %vm558_vm1, %v3221_v43  ;;  %2732 = vmatmul.msk.bf16.gmra.mxu1 %vm558_vm1, %v3189_v1 }
 0x1be   : > { %v1743_v8 = vmax.f32 %v1727_v13, 0.0  ;;  %2750 = vmatmul.msk.bf16.gmra.mxu3 %vm558_vm1, %v3431_v4 }
 0x1c0   : > { %v1759_v2 = vpack.c.bf16 %v1743_v8, %v1743_v8  ;;  %v1463_v39 = vpop.f32.mrf.mxu0  ;;  %v1580_v36 = vpop.f32.mrf.mxu2 }
 0x1c1   : > { %v1675_v37 = vpop.f32.mrf.mxu3  ;;  %v1516_v0 = vadd.f32 %v1515_v18, %v1463_v39 }
 0x1c2   : > { %2705 = vst.msk [vmem:[%s3404_s15 + $0x84] sm:$0xf] %vm981_vm8, %v1759_v2  ;;  %v1712_v28 = vadd.f32 %v1675_v37, %v1612_v14  ;;  %v1520_v15 = vpop.f32.mrf.mxu1 }
 0x1c3   : > { %v1613_v26 = vadd.f32 %v1577_v63, %v1516_v0 }
 0x1c4   : > { %v1728_v45 = vadd.f32 %v3724_v44, %v1712_v28 }
 0x1c6   : > { %v1744_v24 = vmax.f32 %v1728_v45, 0.0 }
 0x1c8   : > { %v1760_v62 = vpack.c.bf16 %v1744_v24, %v1744_v24  ;;  %v1466_v59 = vpop.f32.mrf.mxu0  ;;  %v1582_v32 = vpop.f32.mrf.mxu2 }
 0x1c9   : > { %v1677_v46 = vpop.f32.mrf.mxu3  ;;  %v1519_v52 = vadd.f32 %v1518_v5, %v1466_v59 }
 0x1ca   : > { %2706 = vst.msk [vmem:[%s3404_s15 + $0x88] sm:$0xf] %vm981_vm8, %v1760_v62  ;;  %v1713_v1 = vadd.f32 %v1677_v46, %v1613_v26  ;;  %v1523_v42 = vpop.f32.mrf.mxu1 }
 0x1cb   : > { %2724 = vmatmul.msk.bf16.gmra.mxu0 %vm558_vm1, %v3431_v4  ;;  %v1614_v17 = vadd.f32 %v1580_v36, %v1519_v52 }
 0x1cc   : > { %v1729_v25 = vadd.f32 %v3724_v44, %v1713_v1 }
 0x1cd   : > { %2742 = vmatmul.msk.bf16.gmra.mxu2 %vm558_vm1, %v3251_v10  ;;  %2733 = vmatmul.msk.bf16.gmra.mxu1 %vm558_vm1, %v3221_v43 }
 0x1ce   : > { %v1745_v54 = vmax.f32 %v1729_v25, 0.0  ;;  %2751 = vmatmul.msk.bf16.gmra.mxu3 %vm558_vm1, %v3454_v23 }
 0x1d0   : > { %v1761_v33 = vpack.c.bf16 %v1745_v54, %v1745_v54  ;;  %v1468_v12 = vpop.f32.mrf.mxu0  ;;  %v1585_v47 = vpop.f32.mrf.mxu2 }
 0x1d1   : > { %v1680_v9 = vpop.f32.mrf.mxu3  ;;  %v1521_v11 = vadd.f32 %v1520_v15, %v1468_v12 }
 0x1d2   : > { %2707 = vst.msk [vmem:[%s3404_s15 + $0x8c] sm:$0xf] %vm981_vm8, %v1761_v33  ;;  %v1714_v4 = vadd.f32 %v1680_v9, %v1614_v17  ;;  %v1525_v30 = vpop.f32.mrf.mxu1 }
 0x1d3   : > { %v1615_v50 = vadd.f32 %v1582_v32, %v1521_v11 }
 0x1d4   : > { %v1730_v41 = vadd.f32 %v3724_v44, %v1714_v4 }
 0x1d6   : > { %v1746_v31 = vmax.f32 %v1730_v41, 0.0 }
 0x1d8   : > { %v1762_v6 = vpack.c.bf16 %v1746_v31, %v1746_v31  ;;  %v1471_v29 = vpop.f32.mrf.mxu0  ;;  %v1587_v51 = vpop.f32.mrf.mxu2 }
 0x1d9   : > { %v1682_v16 = vpop.f32.mrf.mxu3  ;;  %v1524_v7 = vadd.f32 %v1523_v42, %v1471_v29 }
 0x1da   : > { %2708 = vst.msk [vmem:[%s3404_s15 + $0x90] sm:$0xf] %vm981_vm8, %v1762_v6  ;;  %v1715_v43 = vadd.f32 %v1682_v16, %v1615_v50  ;;  %v1528_v38 = vpop.f32.mrf.mxu1 }
 0x1db   : > { %2725 = vmatmul.msk.bf16.gmra.mxu0 %vm558_vm1, %v3454_v23  ;;  %v1616_v40 = vadd.f32 %v1585_v47, %v1524_v7 }
 0x1dc   : > { %v1731_v18 = vadd.f32 %v3724_v44, %v1715_v43 }
 0x1dd   : > { %2743 = vmatmul.msk.bf16.gmra.mxu2 %vm558_vm1, %v3283_v55  ;;  %2734 = vmatmul.msk.bf16.gmra.mxu1 %vm558_vm1, %v3251_v10 }
 0x1de   : > { %v1747_v49 = vmax.f32 %v1731_v18, 0.0  ;;  %2752 = vmatmul.msk.bf16.gmra.mxu3 %vm558_vm1, %v3477_v3 }
 0x1e0   : > { %v1763_v61 = vpack.c.bf16 %v1747_v49, %v1747_v49  ;;  %v1473_v20 = vpop.f32.mrf.mxu0  ;;  %v1590_v48 = vpop.f32.mrf.mxu2 }
 0x1e1   : > { %v1685_v63 = vpop.f32.mrf.mxu3  ;;  %v1526_v13 = vadd.f32 %v1525_v30, %v1473_v20  ;;  %v1972_v20 = vrot.slane %v3661_v34, 5 }
 0x1e2   : > { %2709 = vst.msk [vmem:[%s3404_s15 + $0x94] sm:$0xf] %vm981_vm8, %v1763_v61  ;;  %v1716_v23 = vadd.f32 %v1685_v63, %v1616_v40  ;;  %v1530_v5 = vpop.f32.mrf.mxu1 }
 0x1e3   : > { %v1617_v2 = vadd.f32 %v1587_v51, %v1526_v13  ;;  %v2747_v13 = vrot.slane %v3658_v19, 9 }
 0x1e4   : > { %v1732_v56 = vadd.f32 %v3724_v44, %v1716_v23 }
 0x1e6   : > { %v1748_v8 = vmax.f32 %v1732_v56, 0.0 }
 0x1e8   : > { %v1764_v14 = vpack.c.bf16 %v1748_v8, %v1748_v8  ;;  %v1476_v39 = vpop.f32.mrf.mxu0  ;;  %v1592_v36 = vpop.f32.mrf.mxu2 }
 0x1e9   : > { %v1687_v37 = vpop.f32.mrf.mxu3  ;;  %v1529_v28 = vadd.f32 %v1528_v38, %v1476_v39 }
 0x1ea   : > { %2710 = vst.msk [vmem:[%s3404_s15 + $0x98] sm:$0xf] %vm981_vm8, %v1764_v14  ;;  %v1717_v10 = vadd.f32 %v1687_v37, %v1617_v2  ;;  %v1533_v0 = vpop.f32.mrf.mxu1  ;;  %v1973_v37 = vsel %vm3361_vm7, %v2747_v13, %v1972_v20 }
 0x1eb   : > { %2726 = vmatmul.msk.bf16.gmra.mxu0 %vm558_vm1, %v3477_v3  ;;  %v1618_v24 = vadd.f32 %v1590_v48, %v1529_v28 }
 0x1ec   : > { %v1733_v45 = vadd.f32 %v3724_v44, %v1717_v10 }
 0x1ed   : > { %2744 = vmatmul.msk.bf16.gmra.mxu2 %vm558_vm1, %v3322_v53  ;;  %2735 = vmatmul.msk.bf16.gmra.mxu1 %vm558_vm1, %v3283_v55 }
 0x1ee   : > { %v1749_v15 = vmax.f32 %v1733_v45, 0.0  ;;  %2753 = vmatmul.msk.bf16.gmra.mxu3 %vm558_vm1, %v3500_v21 }
 0x1f0   : > { %v1765_v62 = vpack.c.bf16 %v1749_v15, %v1749_v15  ;;  %v1478_v26 = vpop.f32.mrf.mxu0  ;;  %v1595_v46 = vpop.f32.mrf.mxu2 }
 0x1f1   : > { %v1690_v59 = vpop.f32.mrf.mxu3  ;;  %v1531_v1 = vadd.f32 %v1530_v5, %v1478_v26  ;;  %v1975_v5 = vrot.slane %v3671_v27, 5  ;;  %v1979_v27 = vunpack.c.l.b16 %v1973_v37 }
 0x1f2   : > { %2711 = vst.msk [vmem:[%s3404_s15 + $0x9c] sm:$0xf] %vm981_vm8, %v1765_v62  ;;  %v1718_v3 = vadd.f32 %v1690_v59, %v1618_v24  ;;  %v1535_v52 = vpop.f32.mrf.mxu1 }
 0x1f3   : > { %v1619_v54 = vadd.f32 %v1592_v36, %v1531_v1 }
 0x1f4   : > { %v1734_v32 = vadd.f32 %v3724_v44, %v1718_v3 }
 0x1f6   : > { %v1750_v25 = vmax.f32 %v1734_v32, 0.0 }
 0x1f8   : > { %v1766_v42 = vpack.c.bf16 %v1750_v25, %v1750_v25  ;;  %v1481_v17 = vpop.f32.mrf.mxu0  ;;  %v1597_v12 = vpop.f32.mrf.mxu2 }
 0x1f9   : > { %v1692_v33 = vpop.f32.mrf.mxu3  ;;  %v1534_v9 = vadd.f32 %v1533_v0, %v1481_v17 }
 0x1fa   : > { %2712 = vst.msk [vmem:[%s3404_s15 + $0xa0] sm:$0xf] %vm981_vm8, %v1766_v42  ;;  %v1719_v55 = vadd.f32 %v1692_v33, %v1619_v54  ;;  %v1538_v4 = vpop.f32.mrf.mxu1 }
 0x1fb   : > { %2727 = vmatmul.msk.bf16.gmra.mxu0 %vm558_vm1, %v3500_v21  ;;  %v1620_v11 = vadd.f32 %v1595_v46, %v1534_v9 }
 0x1fc   : > { %v1735_v47 = vadd.f32 %v3724_v44, %v1719_v55 }
 0x1fd   : > { %2745 = vmatmul.msk.bf16.gmra.mxu2 %vm558_vm1, %v3354_v35  ;;  %2736 = vmatmul.msk.bf16.gmra.mxu1 %vm558_vm1, %v3322_v53 }
 0x1fe   : > { %v1751_v41 = vmax.f32 %v1735_v47, 0.0  ;;  %2754 = vmatmul.msk.bf16.gmra.mxu3 %vm558_vm1, %v3523_v57 }
 0x200   : > { %v1767_v30 = vpack.c.bf16 %v1751_v41, %v1751_v41  ;;  %v1483_v31 = vpop.f32.mrf.mxu0  ;;  %v1600_v50 = vpop.f32.mrf.mxu2 }
 0x201   : > { %v1695_v6 = vpop.f32.mrf.mxu3  ;;  %v1536_v16 = vadd.f32 %v1535_v52, %v1483_v31 }
 0x202   : > { %2713 = vst.msk [vmem:[%s3404_s15 + $0xa4] sm:$0xf] %vm981_vm8, %v1767_v30  ;;  %v1720_v21 = vadd.f32 %v1695_v6, %v1620_v11  ;;  %v1540_v51 = vpop.f32.mrf.mxu1 }
 0x203   : > { %v1621_v18 = vadd.f32 %v1597_v12, %v1536_v16 }
 0x204   : > { %v1736_v29 = vadd.f32 %v3724_v44, %v1720_v21 }
 0x206   : > { %v1752_v43 = vmax.f32 %v1736_v29, 0.0 }
 0x208   : > { %v1768_v7 = vpack.c.bf16 %v1752_v43, %v1752_v43  ;;  %v1486_v38 = vpop.f32.mrf.mxu0  ;;  %v1602_v40 = vpop.f32.mrf.mxu2 }
 0x209   : > { %v1697_v49 = vpop.f32.mrf.mxu3  ;;  %v1539_v61 = vadd.f32 %v1538_v4, %v1486_v38 }
 0x20a   : > { %2714 = vst.msk [vmem:[%s3404_s15 + $0xa8] sm:$0xf] %vm981_vm8, %v1768_v7  ;;  %v1721_v53 = vadd.f32 %v1697_v49, %v1621_v18  ;;  %v1543_v48 = vpop.f32.mrf.mxu1 }
 0x20b   : > { %2728 = vmatmul.msk.bf16.gmra.mxu0 %vm558_vm1, %v3523_v57  ;;  %v1622_v56 = vadd.f32 %v1600_v50, %v1539_v61  ;;  %v1974_v57 = vrot.slane %v1972_v20, 4 }
 0x20c   : > { %v1737_v63 = vadd.f32 %v3724_v44, %v1721_v53 }
 0x20d   : > { %2746 = vmatmul.msk.bf16.gmra.mxu2 %vm558_vm1, %v3694_v60  ;;  %2737 = vmatmul.msk.bf16.gmra.mxu1 %vm558_vm1, %v3354_v35  ;;  %v1976_v60 = vsel %vm3361_vm7, %v1974_v57, %v1975_v5 }
 0x20e   : > { %v1753_v23 = vmax.f32 %v1737_v63, 0.0  ;;  %2755 = vmatmul.msk.bf16.gmra.mxu3 %vm558_vm1, %v3562_v22  ;;  %v1980_v28 = vunpack.c.l.b16 %v1976_v60 }
 0x210   : > { %v1769_v34 = vpack.c.bf16 %v1753_v23, %v1753_v23  ;;  %v1488_v8 = vpop.f32.mrf.mxu0  ;;  %v1605_v2 = vpop.f32.mrf.mxu2  ;;  %v1981_v46 = vpack.c.b16 %v1980_v28, %v1979_v27 }
 0x211   : > { %v1700_v14 = vpop.f32.mrf.mxu3  ;;  %v1541_v19 = vadd.f32 %v1540_v51, %v1488_v8 }
 0x212   : > { %2715 = vst.msk [vmem:[%s3404_s15 + $0xac] sm:$0xf] %vm981_vm8, %v1769_v34  ;;  %v1722_v39 = vadd.f32 %v1700_v14, %v1622_v56  ;;  %v1545_v36 = vpop.f32.mrf.mxu1 }
 0x213   : > { %v1623_v0 = vadd.f32 %v1602_v40, %v1541_v19 }
 0x214   : > { %v1738_v35 = vadd.f32 %v3724_v44, %v1722_v39 }
 0x216   : > { %v1754_v10 = vmax.f32 %v1738_v35, 0.0 }
 0x218   : > { %v1770_v45 = vpack.c.bf16 %v1754_v10, %v1754_v10  ;;  %v1491_v15 = vpop.f32.mrf.mxu0  ;;  %v1607_v62 = vpop.f32.mrf.mxu2 }
 0x219   : > { %v1702_v24 = vpop.f32.mrf.mxu3  ;;  %v1544_v59 = vadd.f32 %v1543_v48, %v1491_v15 }
 0x21a   : > { %2716 = vst.msk [vmem:[%s3404_s15 + $0xb0] sm:$0xf] %vm981_vm8, %v1770_v45  ;;  %v1723_v26 = vadd.f32 %v1702_v24, %v1623_v0  ;;  %v1859_v3 = vpop.f32.mrf.mxu1 }
 0x21b   : > { %2729 = vmatmul.msk.bf16.gmra.mxu0 %vm558_vm1, %v3562_v22  ;;  %v1624_v1 = vadd.f32 %v1605_v2, %v1544_v59 }
 0x21c   : > { %v1739_v58 = vadd.f32 %v3724_v44, %v1723_v26 }
 0x21e   : > { %v1755_v32 = vmax.f32 %v1739_v58, 0.0  ;;  %2756 = vmatmul.msk.bf16.gmra.mxu3 %vm558_vm1, %v1981_v46 }
 0x220   : > { %v1771_v52 = vpack.c.bf16 %v1755_v32, %v1755_v32  ;;  %v1493_v25 = vpop.f32.mrf.mxu0  ;;  %v1913_v54 = vpop.f32.mrf.mxu2 }
 0x221   : > { %v1705_v42 = vpop.f32.mrf.mxu3  ;;  %v1546_v12 = vadd.f32 %v1545_v36, %v1493_v25 }
 0x222   : > { %2717 = vst.msk [vmem:[%s3404_s15 + $0xb4] sm:$0xf] %vm981_vm8, %v1771_v52  ;;  %v1724_v17 = vadd.f32 %v1705_v42, %v1624_v1  ;;  %v1861_v55 = vpop.f32.mrf.mxu1 }
 0x223   : > { %v1625_v47 = vadd.f32 %v1607_v62, %v1546_v12 }
 0x224   : > { %v1740_v33 = vadd.f32 %v3724_v44, %v1724_v17 }
 0x226   : > { %v1756_v22 = vmax.f32 %v1740_v33, 0.0 }
 0x228   : > { %v1772_v9 = vpack.c.bf16 %v1756_v22, %v1756_v22  ;;  %v1807_v4 = vpop.f32.mrf.mxu0  ;;  %v1915_v11 = vpop.f32.mrf.mxu2 }
 0x229   : > { %v1707_v41 = vpop.f32.mrf.mxu3  ;;  %v1860_v31 = vadd.f32 %v1859_v3, %v1807_v4 }
 0x22a   : > { %2718 = vst.msk [vmem:[%s3404_s15 + $0xb8] sm:$0xf] %vm981_vm8, %v1772_v9  ;;  %v1725_v30 = vadd.f32 %v1707_v41, %v1625_v47  ;;  %v1864_v50 = vpop.f32.mrf.mxu1 }
 0x22b   : > { %v1953_v29 = vadd.f32 %v1913_v54, %v1860_v31 }
 0x22c   : > { %v1741_v6 = vadd.f32 %v3724_v44, %v1725_v30 }
 0x22e   : > { %v1757_v21 = vmax.f32 %v1741_v6, 0.0 }
 0x230   : > { %v1773_v16 = vpack.c.bf16 %v1757_v21, %v1757_v21  ;;  %v1809_v51 = vpop.f32.mrf.mxu0  ;;  %v1918_v7 = vpop.f32.mrf.mxu2 }
 0x231   : > { %v1997_v43 = vpop.f32.mrf.mxu3  ;;  %v1862_v49 = vadd.f32 %v1861_v55, %v1809_v51 }
 0x232   : > { %2719 = vst.msk [vmem:[%s3404_s15 + $0xbc] sm:$0xf] %vm981_vm8, %v1773_v16  ;;  %v2037_v18 = vadd.f32 %v1997_v43, %v1953_v29  ;;  %v1866_v40 = vpop.f32.mrf.mxu1 }
 0x233   : > { %v1954_v20 = vadd.f32 %v1915_v11, %v1862_v49 }
 0x234   : > { %v2053_v38 = vadd.f32 %v3724_v44, %v2037_v18 }
 0x236   : > { %v2069_v53 = vmax.f32 %v2053_v38, 0.0 }
 0x238   : > { %v2085_v61 = vpack.c.bf16 %v2069_v53, %v2069_v53  ;;  %v1812_v63 = vpop.f32.mrf.mxu0  ;;  %v1920_v23 = vpop.f32.mrf.mxu2 }
 0x239   : > { %v1999_v48 = vpop.f32.mrf.mxu3  ;;  %v1865_v13 = vadd.f32 %v1864_v50, %v1812_v63 }
 0x23a   : > { %2757 = vst.msk [vmem:[%s3404_s15 + $0xc0] sm:$0xf] %vm981_vm8, %v2085_v61  ;;  %v2038_v56 = vadd.f32 %v1999_v48, %v1954_v20  ;;  %v1869_v5 = vpop.f32.mrf.mxu1 }
 0x23b   : > { %v1955_v8 = vadd.f32 %v1918_v7, %v1865_v13 }
 0x23c   : > { %v2054_v57 = vadd.f32 %v3724_v44, %v2038_v56 }
 0x23e   : > { %v2070_v34 = vmax.f32 %v2054_v57, 0.0 }
 0x240   : > { %v2086_v14 = vpack.c.bf16 %v2070_v34, %v2070_v34  ;;  %v1814_v2 = vpop.f32.mrf.mxu0  ;;  %v1923_v37 = vpop.f32.mrf.mxu2 }
 0x241   : > { %v2002_v39 = vpop.f32.mrf.mxu3  ;;  %v1867_v19 = vadd.f32 %v1866_v40, %v1814_v2 }
 0x242   : > { %2758 = vst.msk [vmem:[%s3404_s15 + $0xc4] sm:$0xf] %vm981_vm8, %v2086_v14  ;;  %v2039_v60 = vadd.f32 %v2002_v39, %v1955_v8  ;;  %v1871_v36 = vpop.f32.mrf.mxu1 }
 0x243   : > { %v1956_v28 = vadd.f32 %v1920_v23, %v1867_v19 }
 0x244   : > { %v2055_v35 = vadd.f32 %v3724_v44, %v2039_v60 }
 0x246   : > { %v2071_v10 = vmax.f32 %v2055_v35, 0.0 }
 0x248   : > { %v2087_v27 = vpack.c.bf16 %v2071_v10, %v2071_v10  ;;  %v1817_v45 = vpop.f32.mrf.mxu0  ;;  %v1925_v15 = vpop.f32.mrf.mxu2 }
 0x249   : > { %v2004_v0 = vpop.f32.mrf.mxu3  ;;  %v1870_v62 = vadd.f32 %v1869_v5, %v1817_v45 }
 0x24a   : > { %2759 = vst.msk [vmem:[%s3404_s15 + $0xc8] sm:$0xf] %vm981_vm8, %v2087_v27  ;;  %v2040_v24 = vadd.f32 %v2004_v0, %v1956_v28  ;;  %v1874_v59 = vpop.f32.mrf.mxu1 }
 0x24b   : > { %v1957_v58 = vadd.f32 %v1923_v37, %v1870_v62 }
 0x24c   : > { %v2056_v26 = vadd.f32 %v3724_v44, %v2040_v24 }
 0x24e   : > { %v2072_v46 = vmax.f32 %v2056_v26, 0.0 }
 0x250   : > { %v2088_v3 = vpack.c.bf16 %v2072_v46, %v2072_v46  ;;  %v1819_v32 = vpop.f32.mrf.mxu0  ;;  %v1928_v52 = vpop.f32.mrf.mxu2 }
 0x251   : > { %v2007_v1 = vpop.f32.mrf.mxu3  ;;  %v1872_v54 = vadd.f32 %v1871_v36, %v1819_v32 }
 0x252   : > { %2760 = vst.msk [vmem:[%s3404_s15 + $0xcc] sm:$0xf] %vm981_vm8, %v2088_v3  ;;  %v2041_v25 = vadd.f32 %v2007_v1, %v1957_v58  ;;  %v1876_v17 = vpop.f32.mrf.mxu1 }
 0x253   : > { %v1958_v55 = vadd.f32 %v1925_v15, %v1872_v54 }
 0x254   : > { %v2057_v42 = vadd.f32 %v3724_v44, %v2041_v25 }
 0x256   : > { %v2073_v33 = vmax.f32 %v2057_v42, 0.0 }
 0x258   : > { %v2089_v12 = vpack.c.bf16 %v2073_v33, %v2073_v33  ;;  %v1822_v22 = vpop.f32.mrf.mxu0  ;;  %v1930_v47 = vpop.f32.mrf.mxu2 }
 0x259   : > { %v2009_v9 = vpop.f32.mrf.mxu3  ;;  %v1875_v41 = vadd.f32 %v1874_v59, %v1822_v22 }
 0x25a   : > { %2761 = vst.msk [vmem:[%s3404_s15 + $0xd0] sm:$0xf] %vm981_vm8, %v2089_v12  ;;  %v2042_v4 = vadd.f32 %v2009_v9, %v1958_v55  ;;  %v1879_v30 = vpop.f32.mrf.mxu1 }
 0x25b   : > { %v1959_v6 = vadd.f32 %v1928_v52, %v1875_v41 }
 0x25c   : > { %v2058_v11 = vadd.f32 %v3724_v44, %v2042_v4 }
 0x25e   : > { %v2074_v31 = vmax.f32 %v2058_v11, 0.0 }
 0x260   : > { %v2090_v50 = vpack.c.bf16 %v2074_v31, %v2074_v31  ;;  %v1824_v21 = vpop.f32.mrf.mxu0  ;;  %v1933_v16 = vpop.f32.mrf.mxu2 }
 0x261   : > { %v2012_v29 = vpop.f32.mrf.mxu3  ;;  %v1877_v7 = vadd.f32 %v1876_v17, %v1824_v21 }
 0x262   : > { %2762 = vst.msk [vmem:[%s3404_s15 + $0xd4] sm:$0xf] %vm981_vm8, %v2090_v50  ;;  %v2043_v51 = vadd.f32 %v2012_v29, %v1959_v6  ;;  %v1881_v38 = vpop.f32.mrf.mxu1 }
 0x263   : > { %v1960_v40 = vadd.f32 %v1930_v47, %v1877_v7 }
 0x264   : > { %v2059_v43 = vadd.f32 %v3724_v44, %v2043_v51 }
 0x266   : > { %v2075_v18 = vmax.f32 %v2059_v43, 0.0 }
 0x268   : > { %v2091_v49 = vpack.c.bf16 %v2075_v18, %v2075_v18  ;;  %v1827_v53 = vpop.f32.mrf.mxu0  ;;  %v1935_v48 = vpop.f32.mrf.mxu2 }
 0x269   : > { %v2014_v61 = vpop.f32.mrf.mxu3  ;;  %v1880_v63 = vadd.f32 %v1879_v30, %v1827_v53 }
 0x26a   : > { %2763 = vst.msk [vmem:[%s3404_s15 + $0xd8] sm:$0xf] %vm981_vm8, %v2091_v49  ;;  %v2044_v20 = vadd.f32 %v2014_v61, %v1960_v40  ;;  %v1884_v8 = vpop.f32.mrf.mxu1 }
 0x26b   : > { %v1961_v13 = vadd.f32 %v1933_v16, %v1880_v63 }
 0x26c   : > { %v2060_v23 = vadd.f32 %v3724_v44, %v2044_v20 }
 0x26e   : > { %v2076_v56 = vmax.f32 %v2060_v23, 0.0 }
 0x270   : > { %v2092_v57 = vpack.c.bf16 %v2076_v56, %v2076_v56  ;;  %v1829_v5 = vpop.f32.mrf.mxu0  ;;  %v1938_v37 = vpop.f32.mrf.mxu2 }
 0x271   : > { %v2017_v34 = vpop.f32.mrf.mxu3  ;;  %v1882_v39 = vadd.f32 %v1881_v38, %v1829_v5 }
 0x272   : > { %2764 = vst.msk [vmem:[%s3404_s15 + $0xdc] sm:$0xf] %vm981_vm8, %v2092_v57  ;;  %v2045_v14 = vadd.f32 %v2017_v34, %v1961_v13  ;;  %v1886_v45 = vpop.f32.mrf.mxu1 }
 0x273   : > { %v1962_v19 = vadd.f32 %v1935_v48, %v1882_v39 }
 0x274   : > { %v2061_v2 = vadd.f32 %v3724_v44, %v2045_v14 }
 0x276   : > { %v2077_v60 = vmax.f32 %v2061_v2, 0.0 }
 0x278   : > { %v2093_v35 = vpack.c.bf16 %v2077_v60, %v2077_v60  ;;  %v1832_v36 = vpop.f32.mrf.mxu0  ;;  %v1940_v62 = vpop.f32.mrf.mxu2 }
 0x279   : > { %v2019_v10 = vpop.f32.mrf.mxu3  ;;  %v1885_v28 = vadd.f32 %v1884_v8, %v1832_v36  ;;  %v2151_v36 = vld [vmem:[%s3404_s15 + $0x8] sm:$0xff] (%p2993_p5)  }
 0x27a   : > { %2765 = vst.msk [vmem:[%s3404_s15 + $0xe0] sm:$0xf] %vm981_vm8, %v2093_v35  ;;  %v2046_v27 = vadd.f32 %v2019_v10, %v1962_v19  ;;  %v1889_v1 = vpop.f32.mrf.mxu1  ;;  %v2155_v10 = vld [vmem:[%s3404_s15 + $0x10] sm:$0xff] (%p2993_p5)  }
 0x27b   : > { %v1963_v24 = vadd.f32 %v1938_v37, %v1885_v28  ;;  %2152 = vst [vmem:[%s3889_s6 + $0x8] sm:$0xff] (%p2993_p5), %v2151_v36   ;;  %v2163_v28 = vld [vmem:[%s3404_s15 + $0x20] sm:$0xff] (%p2993_p5)  }
 0x27c   : > { %v2062_v0 = vadd.f32 %v3724_v44, %v2046_v27  ;;  %v2159_v27 = vld [vmem:[%s3404_s15 + $0x18] sm:$0xff] (%p2993_p5)   ;;  %2156 = vst [vmem:[%s3889_s6 + $0x10] sm:$0xff] (%p2993_p5), %v2155_v10  }
 0x27d   : > { %2160 = vst [vmem:[%s3889_s6 + $0x18] sm:$0xff] (%p2993_p5), %v2159_v27  }
 0x27e   : > { %v2078_v15 = vmax.f32 %v2062_v0, 0.0  ;;  %v2171_v0 = vld [vmem:[%s3404_s15 + $0x30] sm:$0xff] (%p2993_p5)   ;;  %2164 = vst [vmem:[%s3889_s6 + $0x20] sm:$0xff] (%p2993_p5), %v2163_v28  }
 0x27f   : > { %2172 = vst [vmem:[%s3889_s6 + $0x30] sm:$0xff] (%p2993_p5), %v2171_v0  }
 0x280   : > { %v2094_v26 = vpack.c.bf16 %v2078_v15, %v2078_v15  ;;  %v1834_v59 = vpop.f32.mrf.mxu0  ;;  %v1943_v17 = vpop.f32.mrf.mxu2  ;;  %v2175_v15 = vld [vmem:[%s3404_s15 + $0x38] sm:$0xff] (%p2993_p5)  }
 0x281   : > { %v2022_v46 = vpop.f32.mrf.mxu3  ;;  %v1887_v32 = vadd.f32 %v1886_v45, %v1834_v59  ;;  %v2167_v45 = vld [vmem:[%s3404_s15 + $0x28] sm:$0xff] (%p2993_p5)   ;;  %2176 = vst [vmem:[%s3889_s6 + $0x38] sm:$0xff] (%p2993_p5), %v2175_v15   ;;  %v2191_v59 = vld [vmem:[%s3404_s15 + $0x58] sm:$0xff] (%p2993_p5)  }
 0x282   : > { %2766 = vst.msk [vmem:[%s3404_s15 + $0xe4] sm:$0xf] %vm981_vm8, %v2094_v26  ;;  %v2047_v58 = vadd.f32 %v2022_v46, %v1963_v24  ;;  %v1891_v4 = vpop.f32.mrf.mxu1  ;;  %v2179_v24 = vld [vmem:[%s3404_s15 + $0x40] sm:$0xff] (%p2993_p5)   ;;  %v2187_v26 = vld [vmem:[%s3404_s15 + $0x50] sm:$0xff] (%p2993_p5)  }
 0x283   : > { %v1964_v42 = vadd.f32 %v1940_v62, %v1887_v32  ;;  %2168 = vst [vmem:[%s3889_s6 + $0x28] sm:$0xff] (%p2993_p5), %v2167_v45   ;;  %v2183_v62 = vld [vmem:[%s3404_s15 + $0x48] sm:$0xff] (%p2993_p5)   ;;  %v2195_v46 = vld [vmem:[%s3404_s15 + $0x60] sm:$0xff] (%p2993_p5)   ;;  %v2207_v32 = vld [vmem:[%s3404_s15 + $0x78] sm:$0xff] (%p2993_p5)  }
 0x284   : > { %v2063_v3 = vadd.f32 %v3724_v44, %v2047_v58  ;;  %2180 = vst [vmem:[%s3889_s6 + $0x80] sm:$0xff] (%p2993_p5), %v2179_v24   ;;  %v2199_v58 = vld [vmem:[%s3404_s15 + $0x68] sm:$0xff] (%p2993_p5)  }
 0x285   : > { %2184 = vst [vmem:[%s3889_s6 + $0x88] sm:$0xff] (%p2993_p5), %v2183_v62  }
 0x286   : > { %v2079_v52 = vmax.f32 %v2063_v3, 0.0  ;;  %2188 = vst [vmem:[%s3889_s6 + $0x90] sm:$0xff] (%p2993_p5), %v2187_v26   ;;  %v2203_v3 = vld [vmem:[%s3404_s15 + $0x70] sm:$0xff] (%p2993_p5)  }
 0x287   : > { %2192 = vst [vmem:[%s3889_s6 + $0x98] sm:$0xff] (%p2993_p5), %v2191_v59  }
 0x288   : > { %v2095_v25 = vpack.c.bf16 %v2079_v52, %v2079_v52  ;;  %v1837_v54 = vpop.f32.mrf.mxu0  ;;  %v1945_v6 = vpop.f32.mrf.mxu2  ;;  %2196 = vst [vmem:[%s3889_s6 + $0xa0] sm:$0xff] (%p2993_p5), %v2195_v46   ;;  %v2215_v52 = vld [vmem:[%s3404_s15 + $0x88] sm:$0xff] (%p2993_p5)  }
 0x289   : > { %v2024_v33 = vpop.f32.mrf.mxu3  ;;  %v1890_v55 = vadd.f32 %v1889_v1, %v1837_v54  ;;  %2200 = vst [vmem:[%s3889_s6 + $0xa8] sm:$0xff] (%p2993_p5), %v2199_v58   ;;  %v2211_v1 = vld [vmem:[%s3404_s15 + $0x80] sm:$0xff] (%p2993_p5)  }
 0x28a   : > { %2767 = vst.msk [vmem:[%s3404_s15 + $0xe8] sm:$0xf] %vm981_vm8, %v2095_v25  ;;  %v2048_v12 = vadd.f32 %v2024_v33, %v1964_v42  ;;  %v1894_v7 = vpop.f32.mrf.mxu1  ;;  %v2219_v25 = vld [vmem:[%s3404_s15 + $0x90] sm:$0xff] (%p2993_p5)   ;;  %v2223_v42 = vld [vmem:[%s3404_s15 + $0x98] sm:$0xff] (%p2993_p5)   ;;  %v2227_v54 = vld [vmem:[%s3404_s15 + $0xa0] sm:$0xff] (%p2993_p5)  }
 0x28b   : > { %v1965_v47 = vadd.f32 %v1943_v17, %v1890_v55  ;;  %2204 = vst [vmem:[%s3889_s6 + $0xb0] sm:$0xff] (%p2993_p5), %v2203_v3   ;;  %v2231_v17 = vld [vmem:[%s3404_s15 + $0xa8] sm:$0xff] (%p2993_p5)   ;;  %v2235_v33 = vld [vmem:[%s3404_s15 + $0xb0] sm:$0xff] (%p2993_p5)   ;;  %v2243_v55 = vld [vmem:[%s3404_s15 + $0xc0] sm:$0xff] (%p2993_p5)  }
 0x28c   : > { %v2064_v22 = vadd.f32 %v3724_v44, %v2048_v12  ;;  %2208 = vst [vmem:[%s3889_s6 + $0xb8] sm:$0xff] (%p2993_p5), %v2207_v32   ;;  %v2239_v12 = vld [vmem:[%s3404_s15 + $0xb8] sm:$0xff] (%p2993_p5)  }
 0x28d   : > { %2212 = vst [vmem:[%s3889_s6 + $0x100] sm:$0xff] (%p2993_p5), %v2211_v1  }
 0x28e   : > { %v2080_v9 = vmax.f32 %v2064_v22, 0.0  ;;  %2216 = vst [vmem:[%s3889_s6 + $0x108] sm:$0xff] (%p2993_p5), %v2215_v52   ;;  %v2247_v22 = vld [vmem:[%s3404_s15 + $0xc8] sm:$0xff] (%p2993_p5)  }
 0x28f   : > { %2220 = vst [vmem:[%s3889_s6 + $0x110] sm:$0xff] (%p2993_p5), %v2219_v25  }
 0x290   : > { %v2096_v41 = vpack.c.bf16 %v2080_v9, %v2080_v9  ;;  %v1839_v11 = vpop.f32.mrf.mxu0  ;;  %v1948_v53 = vpop.f32.mrf.mxu2  ;;  %2224 = vst [vmem:[%s3889_s6 + $0x118] sm:$0xff] (%p2993_p5), %v2223_v42   ;;  %v2251_v9 = vld [vmem:[%s3404_s15 + $0xd0] sm:$0xff] (%p2993_p5)  }
 0x291   : > { %v2027_v30 = vpop.f32.mrf.mxu3  ;;  %v1892_v21 = vadd.f32 %v1891_v4, %v1839_v11  ;;  %2228 = vst [vmem:[%s3889_s6 + $0x120] sm:$0xff] (%p2993_p5), %v2227_v54   ;;  %v2259_v4 = vld [vmem:[%s3404_s15 + $0xe0] sm:$0xff] (%p2993_p5)  }
 0x292   : > { %2768 = vst.msk [vmem:[%s3404_s15 + $0xec] sm:$0xf] %vm981_vm8, %v2096_v41  ;;  %v2049_v31 = vadd.f32 %v2027_v30, %v1965_v47  ;;  %v1896_v13 = vpop.f32.mrf.mxu1  ;;  %v2255_v47 = vld [vmem:[%s3404_s15 + $0xd8] sm:$0xff] (%p2993_p5)  }
 0x293   : > { %v1966_v51 = vadd.f32 %v1945_v6, %v1892_v21  ;;  %2232 = vst [vmem:[%s3889_s6 + $0x128] sm:$0xff] (%p2993_p5), %v2231_v17  }
 0x294   : > { %v2065_v50 = vadd.f32 %v3724_v44, %v2049_v31  ;;  %2236 = vst [vmem:[%s3889_s6 + $0x130] sm:$0xff] (%p2993_p5), %v2235_v33  }
 0x295   : > { %2240 = vst [vmem:[%s3889_s6 + $0x138] sm:$0xff] (%p2993_p5), %v2239_v12  }
 0x296   : > { %v2081_v29 = vmax.f32 %v2065_v50, 0.0  ;;  %2244 = vst [vmem:[%s3889_s6 + $0x180] sm:$0xff] (%p2993_p5), %v2243_v55  }
 0x297   : > { %2248 = vst [vmem:[%s3889_s6 + $0x188] sm:$0xff] (%p2993_p5), %v2247_v22  }
 0x298   : > { %v2097_v16 = vpack.c.bf16 %v2081_v29, %v2081_v29  ;;  %v1842_v43 = vpop.f32.mrf.mxu0  ;;  %v1950_v8 = vpop.f32.mrf.mxu2  ;;  %2252 = vst [vmem:[%s3889_s6 + $0x190] sm:$0xff] (%p2993_p5), %v2251_v9  }
 0x299   : > { %v2029_v18 = vpop.f32.mrf.mxu3  ;;  %v1895_v49 = vadd.f32 %v1894_v7, %v1842_v43  ;;  %v2263_v41 = vld [vmem:[%s3404_s15 + $0xe8] sm:$0xff] (%p2993_p5)   ;;  %2256 = vst [vmem:[%s3889_s6 + $0x198] sm:$0xff] (%p2993_p5), %v2255_v47  }
 0x29a   : > { %2769 = vst.msk [vmem:[%s3404_s15 + $0xf0] sm:$0xf] %vm981_vm8, %v2097_v16  ;;  %v2050_v38 = vadd.f32 %v2029_v18, %v1966_v51 }
 0x29b   : > { %v1967_v20 = vadd.f32 %v1948_v53, %v1895_v49  ;;  %2260 = vst [vmem:[%s3889_s6 + $0x1a0] sm:$0xff] (%p2993_p5), %v2259_v4  }
 0x29c   : > { %v2066_v40 = vadd.f32 %v3724_v44, %v2050_v38  ;;  %2264 = vst [vmem:[%s3889_s6 + $0x1a8] sm:$0xff] (%p2993_p5), %v2263_v41  }
 0x29e   : > { %v2082_v61 = vmax.f32 %v2066_v40, 0.0 }
 0x2a0   : > { %v2098_v63 = vpack.c.bf16 %v2082_v61, %v2082_v61  ;;  %v1844_v23 = vpop.f32.mrf.mxu0 }
 0x2a1   : > { %v2032_v48 = vpop.f32.mrf.mxu3  ;;  %v1897_v5 = vadd.f32 %v1896_v13, %v1844_v23 }
 0x2a2   : > { %2770 = vst.msk [vmem:[%s3404_s15 + $0xf4] sm:$0xf] %vm981_vm8, %v2098_v63  ;;  %v2051_v56 = vadd.f32 %v2032_v48, %v1967_v20 }
 0x2a3   : > { %v1968_v2 = vadd.f32 %v1950_v8, %v1897_v5 }
 0x2a4   : > { %v2067_v57 = vadd.f32 %v3724_v44, %v2051_v56 }
 0x2a6   : > { %v2083_v34 = vmax.f32 %v2067_v57, 0.0 }
 0x2a8   : > { %v2099_v14 = vpack.c.bf16 %v2083_v34, %v2083_v34 }
 0x2a9   : > { %v2034_v39 = vpop.f32.mrf.mxu3  ;;  %v2267_v11 = vld [vmem:[%s3404_s15 + $0xf0] sm:$0xff] (%p2993_p5)  }
 0x2aa   : > { %2771 = vst.msk [vmem:[%s3404_s15 + $0xf8] sm:$0xf] %vm981_vm8, %v2099_v14  ;;  %v2052_v37 = vadd.f32 %v2034_v39, %v1968_v2 }
 0x2ab   : > { %2268 = vst [vmem:[%s3889_s6 + $0x1b0] sm:$0xff] (%p2993_p5), %v2267_v11  }
 0x2ac   : > { %v2068_v60 = vadd.f32 %v3724_v44, %v2052_v37  ;;  %v2147_v44 = vld [vmem:[%s3404_s15] sm:$0xff] (%p2993_p5)  }
 0x2ad   : > { %2148 = vst [vmem:[%s3889_s6] sm:$0xff] (%p2993_p5), %v2147_v44  }
 0x2ae   : > { %v2084_v35 = vmax.f32 %v2068_v60, 0.0  ;;  %2124 = sbr.rel (!%p2993_p5) target bundleno = 699 (0x2bb), region = 40 }
 0x2b0   : > { %v2100_v19 = vpack.c.bf16 %v2084_v35, %v2084_v35 }
 0x2b2   : > { %2772 = vst.msk [vmem:[%s3404_s15 + $0xfc] sm:$0xf] %vm981_vm8, %v2100_v19 }
 0x2b9   : > { %v2271_v30 = vld [vmem:[%s3404_s15 + $0xf8] sm:$0xff]  }
 0x2ba   : > { %2272 = vst [vmem:[%s3889_s6 + $0x1b8] sm:$0xff] %v2271_v30  }
 0x2bb PF: > { %s14_s21 = sadd.s32 1, %s2920_s21   ;;  %s3984_s15 = smov %s2900_s16 }
 0x2bc   : > { %p11_p12 = scmp.ge.s32.totalorder %s14_s21, 6   ;;  %s3985_s16 = smov %s3004_s30 }
 0x2bd   : > { %s3986_s17 = smov %s2912_s19  ;;  %s3987_s18 = smov %s2916_s20 }
 0x2be   : > { %s3988_s19 = smov %s3991_s22  ;;  %s3989_s20 = smov %s3995_s23 }
 0x2bf   :  { %13 = sbr.rel (!%p11_p12) target bundleno = 4 (0x4), region = 128 }

</bundles_post_ra>
